<compile_context>
chip_gen: v7x
topology: tpu7x:2x2x1
jax: 0.10.0
libtpu: 0.0.40
codegen_flags: <defaults>
</compile_context>

<pallas_src>
import jax
import jax.numpy as jnp
from jax.experimental import pallas as pl
from jax.experimental.pallas import tpu as pltpu


def _group_gru_kernel(x_ref, h_ref, wx_ref, wh_ref, out_ref):
    """One grid step processes G GRU units.

    Block shapes (G = units fused per grid step):
      x_ref  : (G, B, D)     float32  inputs
      h_ref  : (G, B, H)     float32  previous hidden state
      wx_ref : (3, G, D, H)  bfloat16 x2h weights, gate-split [r, z, n]
      wh_ref : (3, G, H, H)  bfloat16 h2h weights, gate-split [r, z, n]
      out_ref: (G, B, H)     float32  new hidden state
    """
    # bf16 operands into the MXU, f32 accumulation; gating math stays f32.
    x = x_ref[...].astype(jnp.bfloat16)        # (G, B, D)
    h_f32 = h_ref[...]                         # (G, B, H) kept f32 for gating
    h = h_f32.astype(jnp.bfloat16)

    def xdot(w):   # (G,B,D) @ (G,D,H) -> (G,B,H), batch-leading -> no relayout
        return jnp.einsum("gbd,gdh->gbh", x, w,
                          preferred_element_type=jnp.float32)

    def hdot(w):   # (G,B,H) @ (G,H,H) -> (G,B,H)
        return jnp.einsum("gbh,ghk->gbk", h, w,
                          preferred_element_type=jnp.float32)

    # Gate weights pre-split on a leading axis: no lane slicing at H / 2H.
    i_r, i_z, i_n = xdot(wx_ref[0]), xdot(wx_ref[1]), xdot(wx_ref[2])
    h_r, h_z, h_n = hdot(wh_ref[0]), hdot(wh_ref[1]), hdot(wh_ref[2])

    resetgate = jax.nn.sigmoid(i_r + h_r)
    updategate = jax.nn.sigmoid(i_z + h_z)           # PyTorch "inputgate"
    newgate = jnp.tanh(i_n + resetgate * h_n)
    hy = newgate + updategate * (h_f32 - newgate)
    out_ref[...] = hy.astype(out_ref.dtype)


def _choose_group_size(num_units, per_unit_bytes, vmem_budget_bytes):
    """Largest divisor G of num_units whose double-buffered blocks fit the VMEM
    budget, preferring >= 2 grid steps so v7x's two TensorCores both get work
    (no effect on single-TC v5e/v6e)."""
    divisors = [g for g in range(1, num_units + 1) if num_units % g == 0]
    fitting = [g for g in divisors if 2 * g * per_unit_bytes <= vmem_budget_bytes]
    if not fitting:
        return 1
    multi_step = [g for g in fitting if num_units // g >= 2]
    return max(multi_step) if multi_step else max(fitting)


def group_gru_cell_shared(x, hidden, wx_gates, wh_gates,
                          *, vmem_budget_bytes=24 * 1024 * 1024):
    """
    x        : (B, N, D)     float32
    hidden   : (B, N, H)     float32
    wx_gates : (3, N, D, H)  bfloat16 effective x2h weights, gate-split [r, z, n]
    wh_gates : (3, N, H, H)  bfloat16 effective h2h weights, gate-split [r, z, n]
    returns  : (B, N, H)     float32
    """
    B, N, D = x.shape
    H = hidden.shape[-1]
    assert wx_gates.shape == (3, N, D, H)
    assert wh_gates.shape == (3, N, H, H)

    w_bytes = jnp.dtype(wx_gates.dtype).itemsize
    a_bytes = jnp.dtype(x.dtype).itemsize
    # Per-unit bytes resident per grid step: x + h + out blocks (activation dtype)
    # plus the two gate-split weight blocks (streaming dtype).
    per_unit = (B * D + 2 * B * H) * a_bytes + 3 * (D * H + H * H) * w_bytes
    G = _choose_group_size(N, per_unit, vmem_budget_bytes)

    # Units-leading layout: all blocks keep their last two dims equal to the full
    # array dims, so any G is a legal BlockSpec (TPU (8,128) rule).  These
    # transposes move only activation bytes; the weight stream dominates HBM.
    x_u = jnp.transpose(x, (1, 0, 2))        # (N, B, D)
    h_u = jnp.transpose(hidden, (1, 0, 2))   # (N, B, H)

    out_u = pl.pallas_call(
        _group_gru_kernel,
        out_shape=jax.ShapeDtypeStruct((N, B, H), x.dtype),
        grid_spec=pltpu.PrefetchScalarGridSpec(
            num_scalar_prefetch=0,
            grid=(N // G,),
            in_specs=[
                pl.BlockSpec((G, B, D), lambda u: (u, 0, 0)),
                pl.BlockSpec((G, B, H), lambda u: (u, 0, 0)),
                pl.BlockSpec((3, G, D, H), lambda u: (0, u, 0, 0)),
                pl.BlockSpec((3, G, H, H), lambda u: (0, u, 0, 0)),
            ],
            out_specs=pl.BlockSpec((G, B, H), lambda u: (u, 0, 0)),
        ),
        compiler_params=pltpu.CompilerParams(
            dimension_semantics=("parallel",),
            vmem_limit_bytes=48 * 1024 * 1024,  # fits v7x (64 MiB) and v5e/v6e (128 MiB)
        ),
    )(x_u, h_u, wx_gates, wh_gates)

    return jnp.transpose(out_u, (1, 0, 2))   # (B, N, H)


def make_effective_weights(key, din, dout, num_units, num_schemas, number_active):
    """Deterministic synthetic SharedParameters (one-time setup, plain JAX):
      - schema pool S: (num_schemas, din, dout), uniform(+-1/sqrt(din)) a la nn.Linear
      - schema_weighting: softmax over the first `number_active` schemas, 0 elsewhere
      - effective per-unit weight: W_u = sum_s a[u, s] * S_s -> (num_units, din, dout)
    Bias is intentionally absent (the reference forward discards it)."""
    k1, k2 = jax.random.split(key)
    bound = 1.0 / (din ** 0.5)
    schema_w = jax.random.uniform(k1, (num_schemas, din, dout),
                                  minval=-bound, maxval=bound, dtype=jnp.float32)
    logits = jax.random.normal(k2, (num_units, number_active), dtype=jnp.float32)
    active = jax.nn.softmax(logits, axis=-1)
    weighting = jnp.concatenate(
        [active, jnp.zeros((num_units, num_schemas - number_active), jnp.float32)],
        axis=-1)
    return jnp.einsum("us,sdo->udo", weighting, schema_w)    # (N, din, 3H) f32


def split_gates(w_eff, hidden_size, dtype=jnp.bfloat16):
    """(N, din, 3H) -> (3, N, din, H) with gate order [r, z, n] matching
    gate.chunk(3, 2) in the PyTorch forward; cast to the streaming dtype."""
    n, din, dout = w_eff.shape
    assert dout == 3 * hidden_size
    w = w_eff.reshape(n, din, 3, hidden_size)
    return jnp.transpose(w, (2, 0, 1, 3)).astype(dtype)


def reference_group_gru(x, hidden, wx_gates, wh_gates):
    """Pure-JAX f32 reference mirroring the PyTorch forward (per-unit bmm + GRU
    gates), using the same (bf16-rounded) weights the kernel consumes."""
    wx = wx_gates.astype(jnp.float32)   # (3, N, D, H)
    wh = wh_gates.astype(jnp.float32)   # (3, N, H, H)
    gx = jnp.einsum("bnd,knde->kbne", x, wx)        # (3, B, N, H)
    gh = jnp.einsum("bnh,knhe->kbne", hidden, wh)   # (3, B, N, H)
    resetgate = jax.nn.sigmoid(gx[0] + gh[0])
    updategate = jax.nn.sigmoid(gx[1] + gh[1])
    newgate = jnp.tanh(gx[2] + resetgate * gh[2])
    return newgate + updategate * (hidden - newgate)


if __name__ == "__main__":
    batch = 2
    num_grus = 16          # divisible into unit-blocks -> 2 parallel grid steps
    input_size = 16
    hidden_size = 32
    num_schemas = 4
    number_active = 2

    key = jax.random.PRNGKey(0)
    kx, kh, kwx, kwh = jax.random.split(key, 4)

    x = jax.random.normal(kx, (batch, num_grus, input_size), dtype=jnp.float32)
    hidden = jax.random.normal(kh, (batch, num_grus, hidden_size), dtype=jnp.float32)

    # x2h: din=input_size, dout=3H ; h2h: din=hidden_size, dout=3H (schema-mixed)
    wx_eff = make_effective_weights(kwx, input_size, 3 * hidden_size,
                                    num_grus, num_schemas, number_active)
    wh_eff = make_effective_weights(kwh, hidden_size, 3 * hidden_size,
                                    num_grus, num_schemas, number_active)
    wx_gates = split_gates(wx_eff, hidden_size)   # (3, N, D, H) bf16
    wh_gates = split_gates(wh_eff, hidden_size)   # (3, N, H, H) bf16

    hy = group_gru_cell_shared(x, hidden, wx_gates, wh_gates)
    hy = jax.block_until_ready(hy)

    hy_ref = reference_group_gru(x, hidden, wx_gates, wh_gates)
    assert hy.shape == (batch, num_grus, hidden_size)
    # bf16 operands on the MXU (f32 accumulation) vs f32 reference -> loose tol.
    assert jnp.allclose(hy, hy_ref, atol=2e-2, rtol=2e-2), \
        float(jnp.max(jnp.abs(hy - hy_ref)))

    print("KERNEL_OK")
</pallas_src>

<mosaic_0001>
module attributes {stable_mosaic.version = 11 : i64} {
  func.func @_group_gru_kernel(%arg0: i32, %arg1: memref<8x2x16xf32, #tpu.memory_space<vmem>>, %arg2: memref<8x2x32xf32, #tpu.memory_space<vmem>>, %arg3: memref<3x8x16x32xbf16, #tpu.memory_space<vmem>>, %arg4: memref<3x8x32x32xbf16, #tpu.memory_space<vmem>>, %arg5: memref<8x2x32xf32, #tpu.memory_space<vmem>>) attributes {dimension_semantics = [#tpu.dimension_semantics<parallel>], iteration_bounds = array<i64: 2>, scalar_prefetch = 0 : i64, scratch_operands = 0 : i64, tpu.core_type = #tpu.core_type<tc>, window_params = [{transform_indices = @transform_0, window_bounds = array<i64: 8, 2, 16>}, {transform_indices = @transform_1, window_bounds = array<i64: 8, 2, 32>}, {transform_indices = @transform_2, window_bounds = array<i64: 3, 8, 16, 32>}, {transform_indices = @transform_3, window_bounds = array<i64: 3, 8, 32, 32>}, {transform_indices = @transform_4, window_bounds = array<i64: 8, 2, 32>}]} {
    %c0 = arith.constant 0 : index
    %c0_0 = arith.constant 0 : index
    %c0_1 = arith.constant 0 : index
    %0 = vector.load %arg1[%c0, %c0_0, %c0_1] : memref<8x2x16xf32, #tpu.memory_space<vmem>>, vector<8x2x16xf32>
    %1 = arith.truncf %0 : vector<8x2x16xf32> to vector<8x2x16xbf16>
    %c0_2 = arith.constant 0 : index
    %c0_3 = arith.constant 0 : index
    %c0_4 = arith.constant 0 : index
    %2 = vector.load %arg2[%c0_2, %c0_3, %c0_4] : memref<8x2x32xf32, #tpu.memory_space<vmem>>, vector<8x2x32xf32>
    %3 = arith.truncf %2 : vector<8x2x32xf32> to vector<8x2x32xbf16>
    %c0_5 = arith.constant 0 : index
    %c0_6 = arith.constant 0 : index
    %c0_7 = arith.constant 0 : index
    %c0_8 = arith.constant 0 : index
    %4 = vector.load %arg3[%c0_5, %c0_6, %c0_7, %c0_8] : memref<3x8x16x32xbf16, #tpu.memory_space<vmem>>, vector<1x8x16x32xbf16>
    %5 = vector.shape_cast %4 : vector<1x8x16x32xbf16> to vector<8x16x32xbf16>
    "tpu.trace_start"() <{level = 10 : i32, message = "gbd,gdh->gbh"}> : () -> ()
    %cst = arith.constant dense<0.000000e+00> : vector<8x2x32xf32>
    %6 = tpu.matmul %1, %5, %cst {dimension_numbers = #tpu.dot_dimension_numbers<[2], [1], [1], [2], [0, 0, 0, 1, 1, 2], [0], [0]>} : vector<8x2x16xbf16>, vector<8x16x32xbf16>, vector<8x2x32xf32> -> vector<8x2x32xf32>
    "tpu.trace_stop"() : () -> ()
    %c1 = arith.constant 1 : index
    %c0_9 = arith.constant 0 : index
    %c0_10 = arith.constant 0 : index
    %c0_11 = arith.constant 0 : index
    %7 = vector.load %arg3[%c1, %c0_9, %c0_10, %c0_11] : memref<3x8x16x32xbf16, #tpu.memory_space<vmem>>, vector<1x8x16x32xbf16>
    %8 = vector.shape_cast %7 : vector<1x8x16x32xbf16> to vector<8x16x32xbf16>
    "tpu.trace_start"() <{level = 10 : i32, message = "gbd,gdh->gbh"}> : () -> ()
    %cst_12 = arith.constant dense<0.000000e+00> : vector<8x2x32xf32>
    %9 = tpu.matmul %1, %8, %cst_12 {dimension_numbers = #tpu.dot_dimension_numbers<[2], [1], [1], [2], [0, 0, 0, 1, 1, 2], [0], [0]>} : vector<8x2x16xbf16>, vector<8x16x32xbf16>, vector<8x2x32xf32> -> vector<8x2x32xf32>
    "tpu.trace_stop"() : () -> ()
    %c2 = arith.constant 2 : index
    %c0_13 = arith.constant 0 : index
    %c0_14 = arith.constant 0 : index
    %c0_15 = arith.constant 0 : index
    %10 = vector.load %arg3[%c2, %c0_13, %c0_14, %c0_15] : memref<3x8x16x32xbf16, #tpu.memory_space<vmem>>, vector<1x8x16x32xbf16>
    %11 = vector.shape_cast %10 : vector<1x8x16x32xbf16> to vector<8x16x32xbf16>
    "tpu.trace_start"() <{level = 10 : i32, message = "gbd,gdh->gbh"}> : () -> ()
    %cst_16 = arith.constant dense<0.000000e+00> : vector<8x2x32xf32>
    %12 = tpu.matmul %1, %11, %cst_16 {dimension_numbers = #tpu.dot_dimension_numbers<[2], [1], [1], [2], [0, 0, 0, 1, 1, 2], [0], [0]>} : vector<8x2x16xbf16>, vector<8x16x32xbf16>, vector<8x2x32xf32> -> vector<8x2x32xf32>
    "tpu.trace_stop"() : () -> ()
    %c0_17 = arith.constant 0 : index
    %c0_18 = arith.constant 0 : index
    %c0_19 = arith.constant 0 : index
    %c0_20 = arith.constant 0 : index
    %13 = vector.load %arg4[%c0_17, %c0_18, %c0_19, %c0_20] : memref<3x8x32x32xbf16, #tpu.memory_space<vmem>>, vector<1x8x32x32xbf16>
    %14 = vector.shape_cast %13 : vector<1x8x32x32xbf16> to vector<8x32x32xbf16>
    "tpu.trace_start"() <{level = 10 : i32, message = "gbh,ghk->gbk"}> : () -> ()
    %cst_21 = arith.constant dense<0.000000e+00> : vector<8x2x32xf32>
    %15 = tpu.matmul %3, %14, %cst_21 {dimension_numbers = #tpu.dot_dimension_numbers<[2], [1], [1], [2], [0, 0, 0, 1, 1, 2], [0], [0]>} : vector<8x2x32xbf16>, vector<8x32x32xbf16>, vector<8x2x32xf32> -> vector<8x2x32xf32>
    "tpu.trace_stop"() : () -> ()
    %c1_22 = arith.constant 1 : index
    %c0_23 = arith.constant 0 : index
    %c0_24 = arith.constant 0 : index
    %c0_25 = arith.constant 0 : index
    %16 = vector.load %arg4[%c1_22, %c0_23, %c0_24, %c0_25] : memref<3x8x32x32xbf16, #tpu.memory_space<vmem>>, vector<1x8x32x32xbf16>
    %17 = vector.shape_cast %16 : vector<1x8x32x32xbf16> to vector<8x32x32xbf16>
    "tpu.trace_start"() <{level = 10 : i32, message = "gbh,ghk->gbk"}> : () -> ()
    %cst_26 = arith.constant dense<0.000000e+00> : vector<8x2x32xf32>
    %18 = tpu.matmul %3, %17, %cst_26 {dimension_numbers = #tpu.dot_dimension_numbers<[2], [1], [1], [2], [0, 0, 0, 1, 1, 2], [0], [0]>} : vector<8x2x32xbf16>, vector<8x32x32xbf16>, vector<8x2x32xf32> -> vector<8x2x32xf32>
    "tpu.trace_stop"() : () -> ()
    %c2_27 = arith.constant 2 : index
    %c0_28 = arith.constant 0 : index
    %c0_29 = arith.constant 0 : index
    %c0_30 = arith.constant 0 : index
    %19 = vector.load %arg4[%c2_27, %c0_28, %c0_29, %c0_30] : memref<3x8x32x32xbf16, #tpu.memory_space<vmem>>, vector<1x8x32x32xbf16>
    %20 = vector.shape_cast %19 : vector<1x8x32x32xbf16> to vector<8x32x32xbf16>
    "tpu.trace_start"() <{level = 10 : i32, message = "gbh,ghk->gbk"}> : () -> ()
    %cst_31 = arith.constant dense<0.000000e+00> : vector<8x2x32xf32>
    %21 = tpu.matmul %3, %20, %cst_31 {dimension_numbers = #tpu.dot_dimension_numbers<[2], [1], [1], [2], [0, 0, 0, 1, 1, 2], [0], [0]>} : vector<8x2x32xbf16>, vector<8x32x32xbf16>, vector<8x2x32xf32> -> vector<8x2x32xf32>
    "tpu.trace_stop"() : () -> ()
    %22 = arith.addf %6, %15 : vector<8x2x32xf32>
    %23 = arith.negf %22 : vector<8x2x32xf32>
    %24 = math.exp %23 : vector<8x2x32xf32>
    %cst_32 = arith.constant 1.000000e+00 : f32
    %25 = vector.broadcast %cst_32 : f32 to vector<8x2x32xf32>
    %26 = arith.addf %25, %24 : vector<8x2x32xf32>
    %27 = arith.divf %25, %26 : vector<8x2x32xf32>
    %28 = arith.addf %9, %18 : vector<8x2x32xf32>
    %29 = arith.negf %28 : vector<8x2x32xf32>
    %30 = math.exp %29 : vector<8x2x32xf32>
    %cst_33 = arith.constant 1.000000e+00 : f32
    %31 = vector.broadcast %cst_33 : f32 to vector<8x2x32xf32>
    %32 = arith.addf %31, %30 : vector<8x2x32xf32>
    %33 = arith.divf %31, %32 : vector<8x2x32xf32>
    %34 = arith.mulf %27, %21 : vector<8x2x32xf32>
    %35 = arith.addf %12, %34 : vector<8x2x32xf32>
    %36 = math.tanh %35 : vector<8x2x32xf32>
    %37 = arith.subf %2, %36 : vector<8x2x32xf32>
    %38 = arith.mulf %33, %37 : vector<8x2x32xf32>
    %39 = arith.addf %36, %38 : vector<8x2x32xf32>
    %c0_34 = arith.constant 0 : index
    %c0_35 = arith.constant 0 : index
    %c0_36 = arith.constant 0 : index
    %40 = vector.load %arg5[%c0_34, %c0_35, %c0_36] : memref<8x2x32xf32, #tpu.memory_space<vmem>>, vector<8x2x32xf32>
    tpu.vector_store %arg5[%c0_34, %c0_35, %c0_36], %39 {strides = array<i32>} : memref<8x2x32xf32, #tpu.memory_space<vmem>>, vector<8x2x32xf32>,
    return
  }
  func.func @transform_0(%arg0: i32) -> (i32, i32, i32) {
    %c0_i32 = arith.constant 0 : i32
    %c0_i32_0 = arith.constant 0 : i32
    %c0_i32_1 = arith.constant 0 : i32
    return %arg0, %c0_i32, %c0_i32_0 : i32, i32, i32
  }
  func.func @transform_1(%arg0: i32) -> (i32, i32, i32) {
    %c0_i32 = arith.constant 0 : i32
    %c0_i32_0 = arith.constant 0 : i32
    %c0_i32_1 = arith.constant 0 : i32
    return %arg0, %c0_i32, %c0_i32_0 : i32, i32, i32
  }
  func.func @transform_2(%arg0: i32) -> (i32, i32, i32, i32) {
    %c0_i32 = arith.constant 0 : i32
    %c0_i32_0 = arith.constant 0 : i32
    %c0_i32_1 = arith.constant 0 : i32
    %c0_i32_2 = arith.constant 0 : i32
    return %c0_i32, %arg0, %c0_i32_0, %c0_i32_1 : i32, i32, i32, i32
  }
  func.func @transform_3(%arg0: i32) -> (i32, i32, i32, i32) {
    %c0_i32 = arith.constant 0 : i32
    %c0_i32_0 = arith.constant 0 : i32
    %c0_i32_1 = arith.constant 0 : i32
    %c0_i32_2 = arith.constant 0 : i32
    return %c0_i32, %arg0, %c0_i32_0, %c0_i32_1 : i32, i32, i32, i32
  }
  func.func @transform_4(%arg0: i32) -> (i32, i32, i32) {
    %c0_i32 = arith.constant 0 : i32
    %c0_i32_0 = arith.constant 0 : i32
    %c0_i32_1 = arith.constant 0 : i32
    return %arg0, %c0_i32, %c0_i32_0 : i32, i32, i32
  }
}

</mosaic_0001>

<bundles_post_ra>
// kernel: tpu_custom_call.1
= control target key start
LH: loop header
LB: loop body
LE: loop exit
PB: predicated region body
PF: predicated region fallthrough
CT: control target
= control target key end

     0   :  { %s5209_s0 = inlined_call_operand.hbm [shape: f32[16,2,16], index: 0, kind: input, shape index: {}]   ;;  %s5210_s1 = inlined_call_operand.hbm [shape: f32[16,2,32], index: 1, kind: input, shape index: {}]   ;;  %s5211_s2 = inlined_call_operand.hbm [shape: bf16[3,16,16,32], index: 2, kind: input, shape index: {}]   ;;  %s5212_s3 = inlined_call_operand.hbm [shape: bf16[3,16,32,32], index: 3, kind: input, shape index: {}]   ;;  %s5213_s4 = inlined_call_operand.hbm [shape: f32[16,2,32], index: 4, kind: output, shape index: {}]  }
   0x1   :  { %5216 = sst [smem:[#allocation21_spill]] %s5209_s0 }
   0x2   :  { %9 = vsyncpa [#allocation3], 0 }
   0x3   :  { %11 = vsyncpa [#allocation3 + $0x1], 0 }
   0x4   :  { %12 = vsyncpa [#allocation6], 0 }
   0x5   :  { %14 = vsyncpa [#allocation6 + $0x1], 0 }
   0x6   :  { %15 = vsyncpa [#allocation9], 0 }
   0x7   :  { %17 = vsyncpa [#allocation9 + $0x1], 0 }
   0x8   :  { %18 = vsyncpa [#allocation4], 0 }
   0x9   :  { %20 = vsyncpa [#allocation4 + $0x1], 0  ;;  %s4479_s15 = smov 0   ;;  %s4481_s16 = smov 0  }
   0xa   :  { %s4483_s17 = smov 0   ;;  %s4485_s18 = smov 0  }
   0xb LB: > { %s4500_s19 = sadd.s32 4294967295, %s4431_s18   ;;  %s3271_s20 = sadd.s32 4294967294, %s4431_s18   ;;  %s4431_s18 = sphi %s4485_s18, %s5228_s18   ;;  %s4427_s17 = sphi %s4483_s17, %s5227_s17   ;;  %s4423_s16 = sphi %s4481_s16, %s5226_s16   ;;  %s4419_s15 = sphi %s4479_s15, %s5225_s15  }
   0xc   : > { %s4504_s21 = sadd.s32 1, %s4431_s18   ;;  %s33_s22 = sadd.s32 1, %s4427_s17 }
   0xd   : > { %s30_s23 = ssub.s32 %s4431_s18, %s4504_s21  ;;  %p40_p0 = scmp.ne.s32.totalorder %s4427_s17, %s4423_s16 }
   0xe   : > { %p31_p1 = scmp.eq.s32.totalorder %s30_s23, 0  ;;  %p41_p2 = scmp.eq.s32.totalorder %s4431_s18, 0 }
   0xf   : > { %p46_p3 = scmp.ne.s32.totalorder %s4423_s16, %s4419_s15  ;;  %p47_p4 = scmp.eq.s32.totalorder %s4500_s19, 0 }
  0x10   : > { %s4516_s24 = scalar_select %p31_p1, %s4427_s17, %s33_s22  }
  0x11   : > { %p4518_p5 = por %p41_p2, %p40_p0  ;;  %p4522_p6 = por %p47_p4, %p46_p3 }
  0x12   : > { %p148_p7 = scmp.eq.s32.totalorder %s4500_s19, 1  ;;  %p154_p8 = scmp.eq.s32.totalorder %s3271_s20, 1 }
  0x13   : > { %p5214_p11 = scmp.ge.s32.totalorder %s4431_s18, 2 }
  0x14   : > { %p4527_p9 = por %p148_p7, %p40_p0  ;;  %p4531_p10 = por %p154_p8, %p46_p3 }
  0x15   : > { %170 = sbr.rel (%p5214_p11) target bundleno = 105 (0x69), region = 16  ;;  %s4539_s29 = sand.u32 (!%p5214_p11), 1, %s4427_s17  }
  0x16   : > { %s5219_s27 = scalar_select %p4527_p9, 1, 0 }
  0x17   : > { %s5220_s28 = scalar_select %p4531_p10, 1, 0 }
  0x18   : > { %s3531_s30 = sshll.u32 (!%p5214_p11), %s4431_s18, 8  ;;  %s3274_s5 = sshll.u32 (!%p5214_p11), %s4539_s29, 4 }
  0x19   : > { %s5221_s0 = sld [smem:[#allocation21_spill]] (!%p5214_p11)  ;;  %s178_s9 = scalar_lea.vmem (!%p5214_p11), [#allocation2], %s3274_s5 }
  0x1a   : > { %s185_s10 = sshll.u32 (!%p5214_p11), %s178_s9, 4  ;;  %s175_s11 = scalar_lea.sflag (!%p5214_p11), [#allocation3], %s4539_s29  ;;  %s4552_s10 = int_to_ptr.vmem [resolvable:$true] %s185_s10 }
  0x1f   : > { %s4548_s8 = scalar_lea.hbm %s5221_s0, %s3531_s30  ;;  %s4305_s20 = scalar_lea.hbm %s5221_s0, 512 }
  0x20   : > { %s4301_s12 = scalar_lea.hbm %s4548_s8, 256  ;;  %p4306_p1 = scmp.lt.u32.totalorder %s4548_s8, %s5221_s0 }
  0x21   : > { %p4302_p12 = scmp.ne.s32.totalorder %s4548_s8, %s4301_s12  ;;  %p4307_p2 = scmp.lt.u32.totalorder %s4305_s20, %s4301_s12 }
  0x22   : > { %p4309_p4 = scmp.lt.u32.totalorder %s4301_s12, %s4548_s8 }
  0x23   : > { %p4303_p13 = pnand %p4302_p12, %p4518_p5  ;;  %p4308_p3 = por %p4307_p2, %p4306_p1 }
  0x25   : > { %p4304_p0 = pneg %p4303_p13  ;;  %p4310_p7 = por %p4309_p4, %p4308_p3 }
  0x27   : > { %p4311_p8 = pnand %p4310_p7, %p4304_p0 }
  0x29   : > { %4314 = shalt.err (!%p4311_p8)
}
  0x2a   : > { %s4315_s6 = scalar_lea.vmem %s4552_s10, 256  ;;  %s4433_s7 = smov [#allocation2]  }
  0x2b   : > { %p4316_p12 = scmp.ne.s32.totalorder %s4552_s10, %s4315_s6  ;;  %s4319_s9 = sshll.u32 %s4433_s7, 4  ;;  %s4320_s9 = int_to_ptr.vmem [resolvable:$false] %s4319_s9 }
  0x2c   : > { %s4321_s13 = scalar_lea.vmem %s4320_s9, 512  ;;  %p4322_p10 = scmp.lt.s32.totalorder %s4552_s10, %s4320_s9 }
  0x2d   : > { %p4317_p13 = pnand %p4316_p12, %p4518_p5  ;;  %p4323_p9 = scmp.lt.s32.totalorder %s4321_s13, %s4315_s6 }
  0x2f   : > { %p4318_p11 = pneg %p4317_p13  ;;  %p4324_p1 = por %p4323_p9, %p4322_p10 }
  0x31   : > { %p4325_p2 = pnand %p4324_p1, %p4318_p11 }
  0x33   : > { %4328 = shalt.err (!%p4325_p2)
}
  0x34   : > { %s4434_s12 = smov 32   ;;  %s4435_s14 = smov 2  }
  0x35   : > { %4062 = dma.hbm_to_vmem [thread:$0]  (%p4518_p5), %s4548_s8, 256, %s4552_s10, %s175_s11, %s4434_s12, %s4434_s12, %s4435_s14  }
  0x36   : > { %s195_s20 = sand.u32 1, %s4431_s18   ;;  %s4587_s6 = scalar_lea.hbm %s5210_s1, %s3531_s30 }
  0x37   : > { %s199_s7 = scalar_lea.vmem [#allocation5], %s3274_s5  ;;  %s4593_s13 = scalar_lea.sflag [#allocation6], %s195_s20 }
  0x38   : > { %s206_s9 = sshll.u32 %s199_s7, 4  ;;  %s4329_s0 = scalar_lea.hbm %s4587_s6, 256  ;;  %s4591_s9 = int_to_ptr.vmem [resolvable:$true] %s206_s9 }
  0x39   : > { %p4330_p9 = scmp.ne.s32.totalorder %s4587_s6, %s4329_s0  ;;  %s4333_s30 = scalar_lea.hbm %s5210_s1, 512 }
  0x3a   : > { %p4334_p0 = scmp.lt.u32.totalorder %s4587_s6, %s5210_s1  ;;  %p4335_p3 = scmp.lt.u32.totalorder %s4333_s30, %s4329_s0 }
  0x3b   : > { %p4331_p10 = pnand %p4330_p9, %p4518_p5  ;;  %p4337_p7 = scmp.lt.u32.totalorder %s4329_s0, %s4587_s6 }
  0x3c   : > { %p4336_p4 = por %p4335_p3, %p4334_p0 }
  0x3d   : > { %p4332_p11 = pneg %p4331_p10 }
  0x3e   : > { %p4338_p8 = por %p4337_p7, %p4336_p4 }
  0x40   : > { %p4339_p12 = pnand %p4338_p8, %p4332_p11 }
  0x42   : > { %4342 = shalt.err (!%p4339_p12)
}
  0x43   : > { %s4343_s5 = scalar_lea.vmem %s4591_s9, 256  ;;  %s4436_s20 = smov [#allocation5]  }
  0x44   : > { %p4344_p13 = scmp.ne.s32.totalorder %s4591_s9, %s4343_s5  ;;  %s4347_s23 = sshll.u32 %s4436_s20, 4  ;;  %s4348_s23 = int_to_ptr.vmem [resolvable:$false] %s4347_s23 }
  0x45   : > { %s4349_s7 = scalar_lea.vmem %s4348_s23, 512  ;;  %p4350_p9 = scmp.lt.s32.totalorder %s4591_s9, %s4348_s23 }
  0x46   : > { %p4345_p1 = pnand %p4344_p13, %p4518_p5  ;;  %p4351_p10 = scmp.lt.s32.totalorder %s4349_s7, %s4343_s5 }
  0x48   : > { %p4346_p2 = pneg %p4345_p1  ;;  %p4352_p0 = por %p4351_p10, %p4350_p9 }
  0x4a   : > { %p4353_p3 = pnand %p4352_p0, %p4346_p2 }
  0x4c   : > { %4356 = shalt.err (!%p4353_p3)
}
  0x4d   : > { %4063 = dma.hbm_to_vmem [thread:$0]  (%p4518_p5), %s4587_s6, 256, %s4591_s9, %s4593_s13, %s4434_s12, %s4434_s12, %s4435_s14  }
  0x4e   : > { %s4058_s0 = smul.u32 192, %s4539_s29  ;;  %s3534_s8 = sshll.u32 %s4431_s18, 10 }
  0x4f   : > { %s4437_s10 = smov 2048   ;;  %s227_s12 = scalar_lea.hbm %s5211_s2, %s3534_s8 }
  0x50   : > { %4065 = sst [smem:[#allocation12]] (%p4518_p5), %s4437_s10  ;;  %s220_s6 = scalar_lea.vmem [#allocation7], %s4058_s0 }
  0x51   : > { %s4064_s30 = scalar_select %p4518_p5, [#allocation0], [#allocation15] }
  0x52   : > { %s240_s9 = sshll.u32 %s220_s6, 4  ;;  %s4438_s5 = smov 1024   ;;  %s241_s9 = int_to_ptr.vmem [resolvable:$true] %s240_s9 }
  0x53   : > { %s232_s14 = sld [smem:[%s4064_s30]]   ;;  %s4439_s20 = smov 16  }
  0x54   : > { %4066 = sst [smem:[#allocation12 + $0x1]] (%p4518_p5), %s4438_s5  ;;  %s4440_s23 = smov 64  }
  0x55   : > { %4067 = sst [smem:[#allocation12 + $0x2]] (%p4518_p5), %s4439_s20  ;;  %s4441_s7 = smov 4  }
  0x56   : > { %4068 = sst [smem:[#allocation12 + $0x3]] (%p4518_p5), %s4440_s23  ;;  %s4442_s30 = smov [#allocation11]  }
  0x57   : > { %4069 = sst [smem:[#allocation12 + $0x4]] (%p4518_p5), %s4440_s23 }
  0x58   : > { %4070 = sst [smem:[#allocation12 + $0x5]] (%p4518_p5), %s4441_s7 }
  0x59   : > { %s3283_s8 = sshll.u32 %s232_s14, 26 }
  0x5a   : > { %s3284_s10 = sadd.s32 134217728, %s3283_s8 }
  0x5b   : > { %4071 = dma.general (%p4518_p5), %s227_s12, 3072, %s241_s9, %s4593_s13, %s4442_s30, [#allocation12], %s3284_s10, 0  }
  0x5c   : > { %s4059_s0 = smul.u32 384, %s4539_s29  ;;  %s3536_s11 = sshll.u32 %s4431_s18, 11 }
  0x5d   : > { %s4072_s22 = scalar_select %p4518_p5, [#allocation0], [#allocation16] }
  0x5e   : > { %s274_s14 = scalar_lea.hbm %s5212_s3, %s3536_s11  ;;  %s4443_s20 = smov 4096  }
  0x5f   : > { %4073 = sst [smem:[#allocation14]] (%p4518_p5), %s4443_s20  ;;  %s267_s12 = scalar_lea.vmem [#allocation8], %s4059_s0 }
  0x60   : > { %s279_s13 = sld [smem:[%s4072_s22]]   ;;  %s287_s9 = sshll.u32 %s267_s12, 4  ;;  %s288_s9 = int_to_ptr.vmem [resolvable:$true] %s287_s9 }
  0x61   : > { %s4444_s23 = smov 2048   ;;  %s4445_s7 = smov 32  }
  0x62   : > { %4074 = sst [smem:[#allocation14 + $0x1]] (%p4518_p5), %s4444_s23  ;;  %s4446_s8 = smov 64  }
  0x63   : > { %4075 = sst [smem:[#allocation14 + $0x2]] (%p4518_p5), %s4445_s7  ;;  %s4447_s30 = smov 4  }
  0x64   : > { %4076 = sst [smem:[#allocation14 + $0x3]] (%p4518_p5), %s4446_s8  ;;  %s264_s0 = scalar_lea.sflag [#allocation9], %s4539_s29 }
  0x65   : > { %4077 = sst [smem:[#allocation14 + $0x4]] (%p4518_p5), %s4446_s8  ;;  %s4448_s22 = smov [#allocation13]  }
  0x66   : > { %s3288_s10 = sshll.u32 %s279_s13, 26  ;;  %4078 = sst [smem:[#allocation14 + $0x5]] (%p4518_p5), %s4447_s30 }
  0x67   : > { %s3289_s11 = sadd.s32 134217728, %s3288_s10 }
  0x68   : > { %4079 = dma.general (%p4518_p5), %s274_s14, 6144, %s288_s9, %s264_s0, %s4448_s22, [#allocation14], %s3289_s11, 0  }
  0x69 PF: > { %p3290_p11 = scmp.ge.s32.totalorder %s4431_s18, 1  ;;  %p308_p4 = scmp.lt.s32.totalorder %s4431_s18, 3 }
  0x6b   : > { %p309_p7 = pnand %p3290_p11, %p308_p4 }
  0x6c   : > { %s4667_s6 = sand.u32 (!%p309_p7), 1, %s4423_s16  }
  0x6d   : > { %312 = sbr.rel (%p309_p7) target bundleno = 566 (0x236), region = 36  ;;  %s4670_s5 = sshll.u32 (!%p309_p7), %s4667_s6, 4 }
  0x6e   : > { %s315_s29 = scalar_lea.sflag (!%p309_p7), [#allocation3], %s4667_s6  ;;  %s4674_s20 = scalar_lea.vmem (!%p309_p7), [#allocation2], %s4670_s5 }
  0x74   : > { %4402 = dma.done.wait (%p4522_p6), %s315_s29, 256  }
  0x75   : > { %4404 = vsyncadd (%p4522_p6), %s315_s29, 4294967040  ;;  %s323_s25 = sand.u32 1, %s4500_s19   ;;  %s4682_s13 = scalar_lea.vmem [#allocation5], %s4670_s5 }
  0x76   : > { %s324_s14 = scalar_lea.sflag [#allocation6], %s323_s25 }
  0x77   : > { %4406 = dma.done.wait (%p4522_p6), %s324_s14, 3328  }
  0x78   : > { %4408 = vsyncadd (%p4522_p6), %s324_s14, 4294963968  ;;  %s4060_s12 = smul.u32 192, %s4667_s6  ;;  %s342_s7 = scalar_lea.sflag [#allocation9], %s4667_s6 }
  0x79   : > { %s4061_s9 = smul.u32 384, %s4667_s6 }
  0x7a   : > { %s4690_s23 = scalar_lea.vmem [#allocation7], %s4060_s12 }
  0x7b   : > { %s4693_s8 = scalar_lea.vmem [#allocation8], %s4061_s9 }
  0x7c   : > { %4410 = dma.done.wait (%p4522_p6), %s342_s7, 6144  }
  0x7d   : > { %4412 = vsyncadd (%p4522_p6), %s342_s7, 4294961152  ;;  %v4449_v0 = vmov 0.0   ;;  %vm4450_vm0 = vmmov 0   ;;  %v4141_v1 = vld [vmem:[%s4693_s8] sm:$0xff]   ;;  %v4142_v2 = vld [vmem:[%s4693_s8 + $0x10] sm:$0xff]   ;;  %vm517_vm1 = vcmask 261120  }
  0x7e   : > { %3658 = vmatprep.subr.bf16.mxu0 %v4449_v0  ;;  %3666 = vmatprep.subr.bf16.mxu1 %v4449_v0  ;;  %v4143_v3 = vld [vmem:[%s4693_s8 + $0x8] sm:$0xff]   ;;  %v4144_v4 = vld [vmem:[%s4693_s8 + $0x18] sm:$0xff]   ;;  %v407_v5 = vld [vmem:[%s4682_s13] sm:$0x3]  ;;  %vm1850_vm2 = vcmask 130048   ;;  %vm3109_vm3 = vcmask 254976  }
  0x7f   : > { %3662 = vmatprep.mubr.msk.bf16.mxu0 %vm4450_vm0, %v4449_v0  ;;  %3670 = vmatprep.mubr.msk.bf16.mxu1 %vm4450_vm0, %v4449_v0  ;;  %v408_v6 = vld [vmem:[%s4682_s13 + $0x2] sm:$0x3]  ;;  %v4713_v7 = vpack.c.bf16 %v407_v5, %v407_v5  ;;  %v4147_v11 = vld [vmem:[%s4693_s8 + $0x28] sm:$0xff]   ;;  %v4148_v12 = vld [vmem:[%s4693_s8 + $0x38] sm:$0xff]   ;;  %s5132_s26 = scalar_lea.vmem [#allocation10], %s4670_s5  ;;  %s3537_s10 = sshll.u32 %s4500_s19, 8 }
  0x80   : > { %3659 = vmatpush3.bf16.msra.mxu0 %v4141_v1  ;;  %3667 = vmatpush3.bf16.msra.mxu1 %v4142_v2  ;;  %v4715_v8 = vpack.c.bf16 %v408_v6, %v408_v6  ;;  %v4145_v9 = vld [vmem:[%s4693_s8 + $0x20] sm:$0xff]   ;;  %v4146_v10 = vld [vmem:[%s4693_s8 + $0x30] sm:$0xff]   ;;  %v4151_v19 = vld [vmem:[%s4693_s8 + $0x48] sm:$0xff]   ;;  %s3132_s30 = sshll.u32 %s5132_s26, 4  ;;  %s5159_s22 = scalar_lea.hbm %s5213_s4, %s3537_s10  ;;  %s5161_s30 = int_to_ptr.vmem [resolvable:$true] %s3132_s30 }
  0x81   : > { %3660 = vmatprep.subr.bf16.mxu0 %v4449_v0  ;;  %3668 = vmatprep.subr.bf16.mxu1 %v4449_v0  ;;  %v409_v13 = vld [vmem:[%s4682_s13 + $0x4] sm:$0x3]  ;;  %v410_v14 = vld [vmem:[%s4682_s13 + $0x6] sm:$0x3]  ;;  %v4152_v20 = vld [vmem:[%s4693_s8 + $0x58] sm:$0xff]   ;;  %s3119_s19 = scalar_lea.sflag [#allocation4], %s4667_s6 }
  0x82   : > { %v4735_v15 = vpack.c.bf16 %v409_v13, %v409_v13  ;;  %v4737_v16 = vpack.c.bf16 %v410_v14, %v410_v14  ;;  %v4149_v17 = vld [vmem:[%s4693_s8 + $0x40] sm:$0xff]   ;;  %v4150_v18 = vld [vmem:[%s4693_s8 + $0x50] sm:$0xff]   ;;  %v411_v21 = vld [vmem:[%s4682_s13 + $0x8] sm:$0x3]  ;;  %s4357_s5 = scalar_lea.vmem %s5161_s30, 256  ;;  %p5222_p6 = scmp.ne.s32.totalorder %s5219_s27, 0 }
  0x83   : > { %v412_v22 = vld [vmem:[%s4682_s13 + $0xa] sm:$0x3]  ;;  %v4757_v23 = vpack.c.bf16 %v411_v21, %v411_v21  ;;  %v4153_v25 = vld [vmem:[%s4693_s8 + $0x60] sm:$0xff]   ;;  %v4154_v26 = vld [vmem:[%s4693_s8 + $0x70] sm:$0xff]   ;;  %p4358_p5 = scmp.ne.s32.totalorder %s5161_s30, %s4357_s5  ;;  %s4451_s29 = smov [#allocation10]  }
  0x84   : > { %3661 = vmatpush3.bf16.msra.mxu0 %v4143_v3  ;;  %3669 = vmatpush3.bf16.msra.mxu1 %v4144_v4  ;;  %v4759_v24 = vpack.c.bf16 %v412_v22, %v412_v22  ;;  %v4155_v27 = vld [vmem:[%s4693_s8 + $0x68] sm:$0xff]   ;;  %v4156_v28 = vld [vmem:[%s4693_s8 + $0x78] sm:$0xff]   ;;  %v4157_v33 = vld [vmem:[%s4693_s8 + $0x80] sm:$0xff]  }
  0x85   : > { %3674 = vmatprep.subr.bf16.mxu0 %v4449_v0  ;;  %3682 = vmatprep.subr.bf16.mxu1 %v4449_v0  ;;  %v413_v29 = vld [vmem:[%s4682_s13 + $0xc] sm:$0x3]  ;;  %v414_v30 = vld [vmem:[%s4682_s13 + $0xe] sm:$0x3]  ;;  %v4158_v34 = vld [vmem:[%s4693_s8 + $0x90] sm:$0xff]   ;;  %p4359_p8 = pnand %p4358_p5, %p5222_p6 }
  0x86   : > { %v4779_v31 = vpack.c.bf16 %v413_v29, %v413_v29  ;;  %v4781_v32 = vpack.c.bf16 %v414_v30, %v414_v30  ;;  %v4159_v35 = vld [vmem:[%s4693_s8 + $0x88] sm:$0xff]   ;;  %v4160_v36 = vld [vmem:[%s4693_s8 + $0x98] sm:$0xff]   ;;  %v4161_v37 = vld [vmem:[%s4693_s8 + $0xa0] sm:$0xff]  }
  0x87   : > { %3663 = vmatmul.mubr.msk.bf16.vlgmr.msra.gmra.mrb[0].mxu0 %vm517_vm1, %v4713_v7  ;;  %3671 = vmatmul.mubr.msk.bf16.vlgmr.msra.gmra.mrb[0].mxu1 %vm517_vm1, %v4715_v8  ;;  %v4162_v38 = vld [vmem:[%s4693_s8 + $0xb0] sm:$0xff]   ;;  %v4163_v39 = vld [vmem:[%s4693_s8 + $0xa8] sm:$0xff]   ;;  %v4164_v40 = vld [vmem:[%s4693_s8 + $0xb8] sm:$0xff]   ;;  %p4360_p12 = pneg %p4359_p8 }
  0x88   : > { %3675 = vmatpush3.bf16.msra.mxu0 %v4145_v9  ;;  %3683 = vmatpush3.bf16.msra.mxu1 %v4146_v10  ;;  %v4165_v41 = vld [vmem:[%s4693_s8 + $0xc0] sm:$0xff]   ;;  %v4166_v42 = vld [vmem:[%s4693_s8 + $0xd0] sm:$0xff]   ;;  %v4167_v43 = vld [vmem:[%s4693_s8 + $0xc8] sm:$0xff]  }
  0x89   : > { %3676 = vmatprep.subr.bf16.mxu0 %v4449_v0  ;;  %3684 = vmatprep.subr.bf16.mxu1 %v4449_v0  ;;  %v4168_v44 = vld [vmem:[%s4693_s8 + $0xd8] sm:$0xff]   ;;  %v4169_v45 = vld [vmem:[%s4693_s8 + $0xe0] sm:$0xff]   ;;  %v4170_v46 = vld [vmem:[%s4693_s8 + $0xf0] sm:$0xff]  }
  0x8a   : > { %3678 = vmatprep.mubr.msk.bf16.mxu0 %vm4450_vm0, %v4449_v0  ;;  %3686 = vmatprep.mubr.msk.bf16.mxu1 %vm4450_vm0, %v4449_v0  ;;  %v4171_v47 = vld [vmem:[%s4693_s8 + $0xe8] sm:$0xff]   ;;  %v4172_v48 = vld [vmem:[%s4693_s8 + $0xf8] sm:$0xff]   ;;  %v4173_v49 = vld [vmem:[%s4693_s8 + $0x100] sm:$0xff]  }
  0x8b   : > { %v4174_v50 = vld [vmem:[%s4693_s8 + $0x110] sm:$0xff]   ;;  %v4175_v51 = vld [vmem:[%s4693_s8 + $0x108] sm:$0xff]   ;;  %v4176_v52 = vld [vmem:[%s4693_s8 + $0x118] sm:$0xff]  }
  0x8c   : > { %3677 = vmatpush3.bf16.msra.mxu0 %v4147_v11  ;;  %3685 = vmatpush3.bf16.msra.mxu1 %v4148_v12  ;;  %v4177_v53 = vld [vmem:[%s4693_s8 + $0x120] sm:$0xff]   ;;  %v4178_v54 = vld [vmem:[%s4693_s8 + $0x130] sm:$0xff]   ;;  %v4179_v55 = vld [vmem:[%s4693_s8 + $0x128] sm:$0xff]  }
  0x8d   : > { %3690 = vmatprep.subr.bf16.mxu0 %v4449_v0  ;;  %3698 = vmatprep.subr.bf16.mxu1 %v4449_v0  ;;  %v4180_v56 = vld [vmem:[%s4693_s8 + $0x138] sm:$0xff]   ;;  %v4181_v57 = vld [vmem:[%s4693_s8 + $0x140] sm:$0xff]   ;;  %v4182_v58 = vld [vmem:[%s4693_s8 + $0x150] sm:$0xff]  }
  0x8e   : > { %v4183_v59 = vld [vmem:[%s4693_s8 + $0x148] sm:$0xff]   ;;  %v4184_v60 = vld [vmem:[%s4693_s8 + $0x158] sm:$0xff]   ;;  %v4185_v61 = vld [vmem:[%s4693_s8 + $0x160] sm:$0xff]  }
  0x8f   : > { %3679 = vmatmul.mubr.msk.bf16.vlgmr.msra.gmra.mrb[4].mxu0 %vm517_vm1, %v4735_v15  ;;  %3687 = vmatmul.mubr.msk.bf16.vlgmr.msra.gmra.mrb[4].mxu1 %vm517_vm1, %v4737_v16  ;;  %v4186_v62 = vld [vmem:[%s4693_s8 + $0x170] sm:$0xff]   ;;  %v4187_v63 = vld [vmem:[%s4693_s8 + $0x168] sm:$0xff]   ;;  %v4188_v1 = vld [vmem:[%s4693_s8 + $0x178] sm:$0xff]  }
  0x90   : > { %3691 = vmatpush3.bf16.msra.mxu0 %v4149_v17  ;;  %3699 = vmatpush3.bf16.msra.mxu1 %v4150_v18  ;;  %v4189_v2 = vld [vmem:[%s4690_s23] sm:$0xff]   ;;  %v4190_v3 = vld [vmem:[%s4690_s23 + $0x8] sm:$0xff]   ;;  %v4192_v9 = vld [vmem:[%s4690_s23 + $0x18] sm:$0xff]  }
  0x91   : > { %3692 = vmatprep.subr.bf16.mxu0 %v4449_v0  ;;  %3700 = vmatprep.subr.bf16.mxu1 %v4449_v0  ;;  %v391_v4 = vld [vmem:[%s4674_s20] sm:$0x3]  ;;  %v392_v5 = vld [vmem:[%s4674_s20 + $0x2] sm:$0x3]  ;;  %v393_v10 = vld [vmem:[%s4674_s20 + $0x4] sm:$0x3] }
  0x92   : > { %3694 = vmatprep.mubr.msk.bf16.mxu0 %vm4450_vm0, %v4449_v0  ;;  %3702 = vmatprep.mubr.msk.bf16.mxu1 %vm4450_vm0, %v4449_v0  ;;  %v4926_v6 = vpack.c.bf16 %v391_v4, %v391_v4  ;;  %v394_v11 = vld [vmem:[%s4674_s20 + $0x6] sm:$0x3]  ;;  %v4944_v12 = vpack.c.bf16 %v393_v10, %v393_v10  ;;  %v396_v17 = vld [vmem:[%s4674_s20 + $0xa] sm:$0x3]  ;;  %v397_v22 = vld [vmem:[%s4674_s20 + $0xc] sm:$0x3] }
  0x93   : > { %v4947_v13 = vpack.c.bf16 %v394_v11, %v394_v11  ;;  %v4193_v14 = vld [vmem:[%s4690_s23 + $0x20] sm:$0xff]   ;;  %v4196_v21 = vld [vmem:[%s4690_s23 + $0x38] sm:$0xff]  }
  0x94   : > { %3693 = vmatpush3.bf16.msra.mxu0 %v4151_v19  ;;  %3701 = vmatpush3.bf16.msra.mxu1 %v4152_v20  ;;  %v4965_v19 = vpack.c.bf16 %v396_v17, %v396_v17  ;;  %v4195_v20 = vld [vmem:[%s4690_s23 + $0x30] sm:$0xff]   ;;  %v4200_v29 = vld [vmem:[%s4690_s23 + $0x58] sm:$0xff]   ;;  %v4201_v30 = vld [vmem:[%s4690_s23 + $0x60] sm:$0xff]  }
  0x95   : > { %3706 = vmatprep.subr.bf16.mxu0 %v4449_v0  ;;  %3714 = vmatprep.subr.bf16.mxu1 %v4449_v0 }
  0x97   : > { %3695 = vmatmul.mubr.msk.bf16.vlgmr.msra.gmra.mrb[8].mxu0 %vm517_vm1, %v4757_v23  ;;  %3703 = vmatmul.mubr.msk.bf16.vlgmr.msra.gmra.mrb[8].mxu1 %vm517_vm1, %v4759_v24 }
  0x98   : > { %3707 = vmatpush3.bf16.msra.mxu0 %v4153_v25  ;;  %3715 = vmatpush3.bf16.msra.mxu1 %v4154_v26  ;;  %v4197_v26 = vld [vmem:[%s4690_s23 + $0x40] sm:$0xff]  }
  0x99   : > { %3708 = vmatprep.subr.bf16.mxu0 %v4449_v0  ;;  %3716 = vmatprep.subr.bf16.mxu1 %v4449_v0 }
  0x9a   : > { %3710 = vmatprep.mubr.msk.bf16.mxu0 %vm4450_vm0, %v4449_v0  ;;  %3718 = vmatprep.mubr.msk.bf16.mxu1 %vm4450_vm0, %v4449_v0 }
  0x9c   : > { %3709 = vmatpush3.bf16.msra.mxu0 %v4155_v27  ;;  %3717 = vmatpush3.bf16.msra.mxu1 %v4156_v28  ;;  %v4198_v27 = vld [vmem:[%s4690_s23 + $0x48] sm:$0xff]   ;;  %v4199_v28 = vld [vmem:[%s4690_s23 + $0x50] sm:$0xff]  }
  0x9d   : > { %3722 = vmatprep.subr.bf16.mxu0 %v4449_v0  ;;  %3730 = vmatprep.subr.bf16.mxu1 %v4449_v0 }
  0x9f   : > { %3711 = vmatmul.mubr.msk.bf16.vlgmr.msra.gmra.mrb[12].mxu0 %vm517_vm1, %v4779_v31  ;;  %3719 = vmatmul.mubr.msk.bf16.vlgmr.msra.gmra.mrb[12].mxu1 %vm517_vm1, %v4781_v32 }
  0xa0   : > { %3723 = vmatpush3.bf16.msra.mxu0 %v4157_v33  ;;  %3731 = vmatpush3.bf16.msra.mxu1 %v4158_v34  ;;  %v4204_v33 = vld [vmem:[%s4690_s23 + $0x78] sm:$0xff]   ;;  %v4205_v34 = vld [vmem:[%s4690_s23 + $0x80] sm:$0xff]  }
  0xa1   : > { %3724 = vmatprep.subr.bf16.mxu0 %v4449_v0  ;;  %3732 = vmatprep.subr.bf16.mxu1 %v4449_v0 }
  0xa2   : > { %3726 = vmatprep.mubr.msk.bf16.mxu0 %vm4450_vm0, %v4449_v0  ;;  %3734 = vmatprep.mubr.msk.bf16.mxu1 %vm4450_vm0, %v4449_v0 }
  0xa4   : > { %3725 = vmatpush3.bf16.msra.mxu0 %v4159_v35  ;;  %3733 = vmatpush3.bf16.msra.mxu1 %v4160_v36  ;;  %v4206_v35 = vld [vmem:[%s4690_s23 + $0x88] sm:$0xff]   ;;  %v4207_v36 = vld [vmem:[%s4690_s23 + $0x90] sm:$0xff]  }
  0xa5   : > { %3738 = vmatprep.subr.bf16.mxu0 %v4449_v0  ;;  %3746 = vmatprep.subr.bf16.mxu1 %v4449_v0 }
  0xa7   : > { %3727 = vmatmul.mubr.msk.bf16.vlgmr.msra.gmra.mrb[16].mxu0 %vm517_vm1, %v4713_v7  ;;  %3735 = vmatmul.mubr.msk.bf16.vlgmr.msra.gmra.mrb[16].mxu1 %vm517_vm1, %v4715_v8 }
  0xa8   : > { %3739 = vmatpush3.bf16.msra.mxu0 %v4161_v37  ;;  %3747 = vmatpush3.bf16.msra.mxu1 %v4162_v38  ;;  %v4208_v37 = vld [vmem:[%s4690_s23 + $0x98] sm:$0xff]   ;;  %v4209_v38 = vld [vmem:[%s4690_s23 + $0xa0] sm:$0xff]  }
  0xa9   : > { %3740 = vmatprep.subr.bf16.mxu0 %v4449_v0  ;;  %3748 = vmatprep.subr.bf16.mxu1 %v4449_v0 }
  0xaa   : > { %3742 = vmatprep.mubr.msk.bf16.mxu0 %vm4450_vm0, %v4449_v0  ;;  %3750 = vmatprep.mubr.msk.bf16.mxu1 %vm4450_vm0, %v4449_v0 }
  0xac   : > { %3741 = vmatpush3.bf16.msra.mxu0 %v4163_v39  ;;  %3749 = vmatpush3.bf16.msra.mxu1 %v4164_v40  ;;  %v4210_v39 = vld [vmem:[%s4690_s23 + $0xa8] sm:$0xff]   ;;  %v4211_v40 = vld [vmem:[%s4690_s23 + $0xb0] sm:$0xff]  }
  0xad   : > { %3754 = vmatprep.subr.bf16.mxu0 %v4449_v0  ;;  %3762 = vmatprep.subr.bf16.mxu1 %v4449_v0 }
  0xaf   : > { %3743 = vmatmul.mubr.msk.bf16.vlgmr.msra.gmra.mrb[20].mxu0 %vm517_vm1, %v4735_v15  ;;  %3751 = vmatmul.mubr.msk.bf16.vlgmr.msra.gmra.mrb[20].mxu1 %vm517_vm1, %v4737_v16 }
  0xb0   : > { %3755 = vmatpush3.bf16.msra.mxu0 %v4165_v41  ;;  %3763 = vmatpush3.bf16.msra.mxu1 %v4166_v42  ;;  %v4212_v41 = vld [vmem:[%s4690_s23 + $0xb8] sm:$0xff]  }
  0xb1   : > { %3756 = vmatprep.subr.bf16.mxu0 %v4449_v0  ;;  %3764 = vmatprep.subr.bf16.mxu1 %v4449_v0 }
  0xb2   : > { %3758 = vmatprep.mubr.msk.bf16.mxu0 %vm4450_vm0, %v4449_v0  ;;  %3766 = vmatprep.mubr.msk.bf16.mxu1 %vm4450_vm0, %v4449_v0 }
  0xb4   : > { %3757 = vmatpush3.bf16.msra.mxu0 %v4167_v43  ;;  %3765 = vmatpush3.bf16.msra.mxu1 %v4168_v44 }
  0xb5   : > { %3770 = vmatprep.subr.bf16.mxu0 %v4449_v0  ;;  %3778 = vmatprep.subr.bf16.mxu1 %v4449_v0 }
  0xb7   : > { %3759 = vmatmul.mubr.msk.bf16.vlgmr.msra.gmra.mrb[24].mxu0 %vm517_vm1, %v4757_v23  ;;  %3767 = vmatmul.mubr.msk.bf16.vlgmr.msra.gmra.mrb[24].mxu1 %vm517_vm1, %v4759_v24 }
  0xb8   : > { %3771 = vmatpush3.bf16.msra.mxu0 %v4169_v45  ;;  %3779 = vmatpush3.bf16.msra.mxu1 %v4170_v46 }
  0xb9   : > { %3772 = vmatprep.subr.bf16.mxu0 %v4449_v0  ;;  %3780 = vmatprep.subr.bf16.mxu1 %v4449_v0 }
  0xba   : > { %3774 = vmatprep.mubr.msk.bf16.mxu0 %vm4450_vm0, %v4449_v0  ;;  %3782 = vmatprep.mubr.msk.bf16.mxu1 %vm4450_vm0, %v4449_v0 }
  0xbc   : > { %3773 = vmatpush3.bf16.msra.mxu0 %v4171_v47  ;;  %3781 = vmatpush3.bf16.msra.mxu1 %v4172_v48 }
  0xbd   : > { %3786 = vmatprep.subr.bf16.mxu0 %v4449_v0  ;;  %3794 = vmatprep.subr.bf16.mxu1 %v4449_v0 }
  0xbf   : > { %3775 = vmatmul.mubr.msk.bf16.vlgmr.msra.gmra.mrb[28].mxu0 %vm517_vm1, %v4779_v31  ;;  %3783 = vmatmul.mubr.msk.bf16.vlgmr.msra.gmra.mrb[28].mxu1 %vm517_vm1, %v4781_v32 }
  0xc0   : > { %3787 = vmatpush3.bf16.msra.mxu0 %v4173_v49  ;;  %3795 = vmatpush3.bf16.msra.mxu1 %v4174_v50 }
  0xc1   : > { %3788 = vmatprep.subr.bf16.mxu0 %v4449_v0  ;;  %3796 = vmatprep.subr.bf16.mxu1 %v4449_v0 }
  0xc2   : > { %3790 = vmatprep.mubr.msk.bf16.mxu0 %vm4450_vm0, %v4449_v0  ;;  %3798 = vmatprep.mubr.msk.bf16.mxu1 %vm4450_vm0, %v4449_v0 }
  0xc4   : > { %3789 = vmatpush3.bf16.msra.mxu0 %v4175_v51  ;;  %3797 = vmatpush3.bf16.msra.mxu1 %v4176_v52 }
  0xc5   : > { %3802 = vmatprep.subr.bf16.mxu0 %v4449_v0  ;;  %3810 = vmatprep.subr.bf16.mxu1 %v4449_v0 }
  0xc7   : > { %3791 = vmatmul.mubr.msk.bf16.vlgmr.msra.gmra.mrb[32].mxu0 %vm517_vm1, %v4713_v7  ;;  %3799 = vmatmul.mubr.msk.bf16.vlgmr.msra.gmra.mrb[32].mxu1 %vm517_vm1, %v4715_v8  ;;  %v4929_v7 = vpack.c.bf16 %v392_v5, %v392_v5  ;;  %v4191_v8 = vld [vmem:[%s4690_s23 + $0x10] sm:$0xff]  }
  0xc8   : > { %3803 = vmatpush3.bf16.msra.mxu0 %v4177_v53  ;;  %3811 = vmatpush3.bf16.msra.mxu1 %v4178_v54 }
  0xc9   : > { %3804 = vmatprep.subr.bf16.mxu0 %v4449_v0  ;;  %3812 = vmatprep.subr.bf16.mxu1 %v4449_v0 }
  0xca   : > { %3806 = vmatprep.mubr.msk.bf16.mxu0 %vm4450_vm0, %v4449_v0  ;;  %3814 = vmatprep.mubr.msk.bf16.mxu1 %vm4450_vm0, %v4449_v0 }
  0xcc   : > { %3805 = vmatpush3.bf16.msra.mxu0 %v4179_v55  ;;  %3813 = vmatpush3.bf16.msra.mxu1 %v4180_v56 }
  0xcd   : > { %3818 = vmatprep.subr.bf16.mxu0 %v4449_v0  ;;  %3826 = vmatprep.subr.bf16.mxu1 %v4449_v0 }
  0xcf   : > { %3807 = vmatmul.mubr.msk.bf16.vlgmr.msra.gmra.mrb[36].mxu0 %vm517_vm1, %v4735_v15  ;;  %3815 = vmatmul.mubr.msk.bf16.vlgmr.msra.gmra.mrb[36].mxu1 %vm517_vm1, %v4737_v16  ;;  %v4194_v15 = vld [vmem:[%s4690_s23 + $0x28] sm:$0xff]  }
  0xd0   : > { %3819 = vmatpush3.bf16.msra.mxu0 %v4181_v57  ;;  %3827 = vmatpush3.bf16.msra.mxu1 %v4182_v58  ;;  %v395_v16 = vld [vmem:[%s4674_s20 + $0x8] sm:$0x3] }
  0xd1   : > { %3820 = vmatprep.subr.bf16.mxu0 %v4449_v0  ;;  %3828 = vmatprep.subr.bf16.mxu1 %v4449_v0  ;;  %v4962_v18 = vpack.c.bf16 %v395_v16, %v395_v16 }
  0xd2   : > { %3822 = vmatprep.mubr.msk.bf16.mxu0 %vm4450_vm0, %v4449_v0  ;;  %3830 = vmatprep.mubr.msk.bf16.mxu1 %vm4450_vm0, %v4449_v0 }
  0xd4   : > { %3821 = vmatpush3.bf16.msra.mxu0 %v4183_v59  ;;  %3829 = vmatpush3.bf16.msra.mxu1 %v4184_v60 }
  0xd5   : > { %3834 = vmatprep.subr.bf16.mxu0 %v4449_v0  ;;  %3842 = vmatprep.subr.bf16.mxu1 %v4449_v0 }
  0xd7   : > { %3823 = vmatmul.mubr.msk.bf16.vlgmr.msra.gmra.mrb[40].mxu0 %vm517_vm1, %v4757_v23  ;;  %3831 = vmatmul.mubr.msk.bf16.vlgmr.msra.gmra.mrb[40].mxu1 %vm517_vm1, %v4759_v24  ;;  %v398_v23 = vld [vmem:[%s4674_s20 + $0xe] sm:$0x3]  ;;  %v4980_v24 = vpack.c.bf16 %v397_v22, %v397_v22  ;;  %s4361_s20 = sshll.u32 %s4451_s29, 4  ;;  %s4362_s20 = int_to_ptr.vmem [resolvable:$false] %s4361_s20 }
  0xd8   : > { %3835 = vmatpush3.bf16.msra.mxu0 %v4185_v61  ;;  %3843 = vmatpush3.bf16.msra.mxu1 %v4186_v62  ;;  %v4983_v25 = vpack.c.bf16 %v398_v23, %v398_v23  ;;  %s4363_s25 = scalar_lea.vmem %s4362_s20, 512  ;;  %p4364_p13 = scmp.lt.s32.totalorder %s5161_s30, %s4362_s20 }
  0xd9   : > { %3836 = vmatprep.subr.bf16.mxu0 %v4449_v0  ;;  %3844 = vmatprep.subr.bf16.mxu1 %v4449_v0  ;;  %p4365_p1 = scmp.lt.s32.totalorder %s4363_s25, %s4357_s5 }
  0xda   : > { %3838 = vmatprep.mubr.msk.bf16.mxu0 %vm4450_vm0, %v4449_v0  ;;  %3846 = vmatprep.mubr.msk.bf16.mxu1 %vm4450_vm0, %v4449_v0 }
  0xdb   : > { %p4366_p2 = por %p4365_p1, %p4364_p13 }
  0xdc   : > { %3837 = vmatpush3.bf16.msra.mxu0 %v4187_v63  ;;  %3845 = vmatpush3.bf16.msra.mxu1 %v4188_v1 }
  0xdd   : > { %3850 = vmatprep.subr.bf16.mxu0 %v4449_v0  ;;  %3856 = vmatprep.subr.bf16.mxu1 %v4449_v0  ;;  %p4367_p9 = pnand %p4366_p2, %p4360_p12 }
  0xdf   : > { %3839 = vmatmul.mubr.msk.bf16.vlgmr.msra.gmra.mrb[44].mxu0 %vm517_vm1, %v4779_v31  ;;  %3847 = vmatmul.mubr.msk.bf16.vlgmr.msra.gmra.mrb[44].mxu1 %vm517_vm1, %v4781_v32  ;;  %v4202_v31 = vld [vmem:[%s4690_s23 + $0x68] sm:$0xff]   ;;  %v4203_v32 = vld [vmem:[%s4690_s23 + $0x70] sm:$0xff]  }
  0xe0   : > { %3851 = vmatpush3.bf16.msra.mxu0 %v4189_v2  ;;  %3857 = vmatpush3.bf16.msra.mxu1 %v4190_v3 }
  0xe1   : > { %3852 = vmatprep.mubr.msk.bf16.mxu0 %vm4450_vm0, %v4449_v0  ;;  %3858 = vmatprep.mubr.msk.bf16.mxu1 %vm4450_vm0, %v4449_v0 }
  0xe2   : > { %3862 = vmatprep.subr.bf16.mxu0 %v4449_v0  ;;  %3868 = vmatprep.subr.bf16.mxu1 %v4449_v0 }
  0xe7   : > { %3853 = vmatmul.mubr.msk.bf16.vlgmr.msra.gmra.mrb[0].mxu0 %vm1850_vm2, %v4926_v6  ;;  %3859 = vmatmul.mubr.msk.bf16.vlgmr.msra.gmra.mrb[0].mxu1 %vm1850_vm2, %v4929_v7 }
  0xe8   : > { %3863 = vmatpush3.bf16.msra.mxu0 %v4191_v8  ;;  %3869 = vmatpush3.bf16.msra.mxu1 %v4192_v9 }
  0xe9   : > { %3864 = vmatprep.mubr.msk.bf16.mxu0 %vm4450_vm0, %v4449_v0  ;;  %3870 = vmatprep.mubr.msk.bf16.mxu1 %vm4450_vm0, %v4449_v0 }
  0xea   : > { %3874 = vmatprep.subr.bf16.mxu0 %v4449_v0  ;;  %3880 = vmatprep.subr.bf16.mxu1 %v4449_v0 }
  0xef   : > { %3865 = vmatmul.mubr.msk.bf16.vlgmr.msra.gmra.mrb[4].mxu0 %vm1850_vm2, %v4944_v12  ;;  %3871 = vmatmul.mubr.msk.bf16.vlgmr.msra.gmra.mrb[4].mxu1 %vm1850_vm2, %v4947_v13 }
  0xf0   : > { %3875 = vmatpush3.bf16.msra.mxu0 %v4193_v14  ;;  %3881 = vmatpush3.bf16.msra.mxu1 %v4194_v15 }
  0xf1   : > { %3876 = vmatprep.mubr.msk.bf16.mxu0 %vm4450_vm0, %v4449_v0  ;;  %3882 = vmatprep.mubr.msk.bf16.mxu1 %vm4450_vm0, %v4449_v0 }
  0xf2   : > { %3886 = vmatprep.subr.bf16.mxu0 %v4449_v0  ;;  %3892 = vmatprep.subr.bf16.mxu1 %v4449_v0 }
  0xf7   : > { %3877 = vmatmul.mubr.msk.bf16.vlgmr.msra.gmra.mrb[8].mxu0 %vm1850_vm2, %v4962_v18  ;;  %3883 = vmatmul.mubr.msk.bf16.vlgmr.msra.gmra.mrb[8].mxu1 %vm1850_vm2, %v4965_v19 }
  0xf8   : > { %3887 = vmatpush3.bf16.msra.mxu0 %v4195_v20  ;;  %3893 = vmatpush3.bf16.msra.mxu1 %v4196_v21 }
  0xf9   : > { %3888 = vmatprep.mubr.msk.bf16.mxu0 %vm4450_vm0, %v4449_v0  ;;  %3894 = vmatprep.mubr.msk.bf16.mxu1 %vm4450_vm0, %v4449_v0 }
  0xfa   : > { %3898 = vmatprep.subr.bf16.mxu0 %v4449_v0  ;;  %3904 = vmatprep.subr.bf16.mxu1 %v4449_v0 }
  0xff   : > { %3889 = vmatmul.mubr.msk.bf16.vlgmr.msra.gmra.mrb[12].mxu0 %vm1850_vm2, %v4980_v24  ;;  %3895 = vmatmul.mubr.msk.bf16.vlgmr.msra.gmra.mrb[12].mxu1 %vm1850_vm2, %v4983_v25 }
 0x100   : > { %3899 = vmatpush3.bf16.msra.mxu0 %v4197_v26  ;;  %3905 = vmatpush3.bf16.msra.mxu1 %v4198_v27 }
 0x101   : > { %3900 = vmatprep.mubr.msk.bf16.mxu0 %vm4450_vm0, %v4449_v0  ;;  %3906 = vmatprep.mubr.msk.bf16.mxu1 %vm4450_vm0, %v4449_v0 }
 0x102   : > { %3910 = vmatprep.subr.bf16.mxu0 %v4449_v0  ;;  %3916 = vmatprep.subr.bf16.mxu1 %v4449_v0 }
 0x107   : > { %3901 = vmatmul.mubr.msk.bf16.vlgmr.msra.gmra.mrb[16].mxu0 %vm1850_vm2, %v4926_v6  ;;  %3907 = vmatmul.mubr.msk.bf16.vlgmr.msra.gmra.mrb[16].mxu1 %vm1850_vm2, %v4929_v7 }
 0x108   : > { %3911 = vmatpush3.bf16.msra.mxu0 %v4199_v28  ;;  %3917 = vmatpush3.bf16.msra.mxu1 %v4200_v29 }
 0x109   : > { %3912 = vmatprep.mubr.msk.bf16.mxu0 %vm4450_vm0, %v4449_v0  ;;  %3918 = vmatprep.mubr.msk.bf16.mxu1 %vm4450_vm0, %v4449_v0 }
 0x10a   : > { %3922 = vmatprep.subr.bf16.mxu0 %v4449_v0  ;;  %3928 = vmatprep.subr.bf16.mxu1 %v4449_v0 }
 0x10f   : > { %3913 = vmatmul.mubr.msk.bf16.vlgmr.msra.gmra.mrb[20].mxu0 %vm1850_vm2, %v4944_v12  ;;  %3919 = vmatmul.mubr.msk.bf16.vlgmr.msra.gmra.mrb[20].mxu1 %vm1850_vm2, %v4947_v13 }
 0x110   : > { %3923 = vmatpush3.bf16.msra.mxu0 %v4201_v30  ;;  %3929 = vmatpush3.bf16.msra.mxu1 %v4202_v31 }
 0x111   : > { %3924 = vmatprep.mubr.msk.bf16.mxu0 %vm4450_vm0, %v4449_v0  ;;  %3930 = vmatprep.mubr.msk.bf16.mxu1 %vm4450_vm0, %v4449_v0 }
 0x112   : > { %3934 = vmatprep.subr.bf16.mxu0 %v4449_v0  ;;  %3940 = vmatprep.subr.bf16.mxu1 %v4449_v0 }
 0x117   : > { %3925 = vmatmul.mubr.msk.bf16.vlgmr.msra.gmra.mrb[24].mxu0 %vm1850_vm2, %v4962_v18  ;;  %3931 = vmatmul.mubr.msk.bf16.vlgmr.msra.gmra.mrb[24].mxu1 %vm1850_vm2, %v4965_v19 }
 0x118   : > { %3935 = vmatpush3.bf16.msra.mxu0 %v4203_v32  ;;  %3941 = vmatpush3.bf16.msra.mxu1 %v4204_v33 }
 0x119   : > { %3936 = vmatprep.mubr.msk.bf16.mxu0 %vm4450_vm0, %v4449_v0  ;;  %3942 = vmatprep.mubr.msk.bf16.mxu1 %vm4450_vm0, %v4449_v0 }
 0x11a   : > { %3946 = vmatprep.subr.bf16.mxu0 %v4449_v0  ;;  %3952 = vmatprep.subr.bf16.mxu1 %v4449_v0 }
 0x11f   : > { %3937 = vmatmul.mubr.msk.bf16.vlgmr.msra.gmra.mrb[28].mxu0 %vm1850_vm2, %v4980_v24  ;;  %3943 = vmatmul.mubr.msk.bf16.vlgmr.msra.gmra.mrb[28].mxu1 %vm1850_vm2, %v4983_v25 }
 0x120   : > { %3947 = vmatpush3.bf16.msra.mxu0 %v4205_v34  ;;  %3953 = vmatpush3.bf16.msra.mxu1 %v4206_v35 }
 0x121   : > { %3948 = vmatprep.mubr.msk.bf16.mxu0 %vm4450_vm0, %v4449_v0  ;;  %3954 = vmatprep.mubr.msk.bf16.mxu1 %vm4450_vm0, %v4449_v0 }
 0x122   : > { %3958 = vmatprep.subr.bf16.mxu0 %v4449_v0  ;;  %3964 = vmatprep.subr.bf16.mxu1 %v4449_v0 }
 0x127   : > { %3949 = vmatmul.mubr.msk.bf16.vlgmr.msra.gmra.mrb[48].mxu0 %vm1850_vm2, %v4926_v6  ;;  %3955 = vmatmul.mubr.msk.bf16.vlgmr.msra.gmra.mrb[48].mxu1 %vm1850_vm2, %v4929_v7 }
 0x128   : > { %3959 = vmatpush3.bf16.msra.mxu0 %v4207_v36  ;;  %3965 = vmatpush3.bf16.msra.mxu1 %v4208_v37 }
 0x129   : > { %3960 = vmatprep.mubr.msk.bf16.mxu0 %vm4450_vm0, %v4449_v0  ;;  %3966 = vmatprep.mubr.msk.bf16.mxu1 %vm4450_vm0, %v4449_v0 }
 0x12a   : > { %3970 = vmatprep.subr.bf16.mxu0 %v4449_v0  ;;  %3976 = vmatprep.subr.bf16.mxu1 %v4449_v0 }
 0x12f   : > { %3961 = vmatmul.mubr.msk.bf16.vlgmr.msra.gmra.mrb[52].mxu0 %vm1850_vm2, %v4944_v12  ;;  %3967 = vmatmul.mubr.msk.bf16.vlgmr.msra.gmra.mrb[52].mxu1 %vm1850_vm2, %v4947_v13 }
 0x130   : > { %3971 = vmatpush3.bf16.msra.mxu0 %v4209_v38  ;;  %3977 = vmatpush3.bf16.msra.mxu1 %v4210_v39 }
 0x131   : > { %3972 = vmatprep.mubr.msk.bf16.mxu0 %vm4450_vm0, %v4449_v0  ;;  %3978 = vmatprep.mubr.msk.bf16.mxu1 %vm4450_vm0, %v4449_v0 }
 0x132   : > { %3982 = vmatprep.subr.bf16.mxu0 %v4449_v0  ;;  %3988 = vmatprep.subr.bf16.mxu1 %v4449_v0 }
 0x137   : > { %3973 = vmatmul.mubr.msk.bf16.vlgmr.msra.gmra.mrb[56].mxu0 %vm1850_vm2, %v4962_v18  ;;  %3979 = vmatmul.mubr.msk.bf16.vlgmr.msra.gmra.mrb[56].mxu1 %vm1850_vm2, %v4965_v19 }
 0x138   : > { %3983 = vmatpush3.bf16.msra.mxu0 %v4211_v40  ;;  %3989 = vmatpush3.bf16.msra.mxu1 %v4212_v41 }
 0x139   : > { %3984 = vmatprep.mubr.msk.bf16.mxu0 %vm4450_vm0, %v4449_v0  ;;  %3990 = vmatprep.mubr.msk.bf16.mxu1 %vm4450_vm0, %v4449_v0 }
 0x13f   : > { %3985 = vmatmul.mubr.msk.bf16.vlgmr.msra.gmra.mrb[60].mxu0 %vm1850_vm2, %v4980_v24  ;;  %3991 = vmatmul.mubr.msk.bf16.vlgmr.msra.gmra.mrb[60].mxu1 %vm1850_vm2, %v4983_v25 }
 0x19a   : > { %v5083_v42 = vpop.f32.mrb[32].mxu0  ;;  %v5085_v43 = vpop.f32.mrb[32].mxu1 }
 0x19b   : > { %v3792_v44 = vpop.f32.mrb[33].mxu0  ;;  %v3800_v45 = vpop.f32.mrb[33].mxu1 }
 0x19c   : > { %v1477_v46 = vpop.f32.mrb[34].mxu0  ;;  %v1529_v47 = vpop.f32.mrb[34].mxu1 }
 0x19d   : > { %v3793_v48 = vpop.f32.mrb[35].mxu0  ;;  %v3801_v49 = vpop.f32.mrb[35].mxu1 }
 0x1a2   : > { %v5087_v50 = vpop.f32.mrb[36].mxu0  ;;  %v5089_v51 = vpop.f32.mrb[36].mxu1 }
 0x1a3   : > { %v3808_v0 = vpop.f32.mrb[37].mxu0  ;;  %v3816_v52 = vpop.f32.mrb[37].mxu1 }
 0x1a4   : > { %v1581_v53 = vpop.f32.mrb[38].mxu0  ;;  %v1633_v54 = vpop.f32.mrb[38].mxu1 }
 0x1a5   : > { %v3809_v55 = vpop.f32.mrb[39].mxu0  ;;  %v3817_v56 = vpop.f32.mrb[39].mxu1 }
 0x1aa   : > { %v5091_v57 = vpop.f32.mrb[40].mxu0  ;;  %v5093_v58 = vpop.f32.mrb[40].mxu1 }
 0x1ab   : > { %v3824_v59 = vpop.f32.mrb[41].mxu0  ;;  %v3832_v60 = vpop.f32.mrb[41].mxu1 }
 0x1ac   : > { %v1685_v61 = vpop.f32.mrb[42].mxu0  ;;  %v1737_v62 = vpop.f32.mrb[42].mxu1 }
 0x1ad   : > { %v3825_v63 = vpop.f32.mrb[43].mxu0  ;;  %v3833_v1 = vpop.f32.mrb[43].mxu1 }
 0x1b2   : > { %v5095_v2 = vpop.f32.mrb[44].mxu0  ;;  %v5097_v3 = vpop.f32.mrb[44].mxu1 }
 0x1b3   : > { %v3840_v4 = vpop.f32.mrb[45].mxu0  ;;  %v3848_v5 = vpop.f32.mrb[45].mxu1 }
 0x1b4   : > { %v1789_v6 = vpop.f32.mrb[46].mxu0  ;;  %v1841_v7 = vpop.f32.mrb[46].mxu1 }
 0x1b5   : > { %v3841_v8 = vpop.f32.mrb[47].mxu0  ;;  %v3849_v9 = vpop.f32.mrb[47].mxu1 }
 0x1ba   : > { %v1888_v10 = vpop.f32.mrb[0].mxu0  ;;  %v1937_v12 = vpop.f32.mrb[0].mxu1 }
 0x1bb   : > { %v3478_v11 = vmul.f32 -1.442695, %v1888_v10  ;;  %v3854_v13 = vpop.f32.mrb[1].mxu0  ;;  %v3479_v14 = vmul.f32 -1.442695, %v1937_v12  ;;  %v3860_v15 = vpop.f32.mrb[1].mxu1 }
 0x1bc   : > { %v1891_v16 = vpop.f32.mrb[2].mxu0  ;;  %v1940_v17 = vpop.f32.mrb[2].mxu1 }
 0x1bd   : > { %4213 = vpow2.f32 %v3478_v11  ;;  %v3855_v18 = vpop.f32.mrb[3].mxu0  ;;  %v3861_v19 = vpop.f32.mrb[3].mxu1 }
 0x1be   : > { %4215 = vpow2.f32 %v3479_v14 }
 0x1c2   : > { %v1986_v20 = vpop.f32.mrb[4].mxu0  ;;  %v2035_v22 = vpop.f32.mrb[4].mxu1 }
 0x1c3   : > { %v3480_v21 = vmul.f32 -1.442695, %v1986_v20  ;;  %v3866_v23 = vpop.f32.mrb[5].mxu0  ;;  %v3481_v24 = vmul.f32 -1.442695, %v2035_v22  ;;  %v3872_v25 = vpop.f32.mrb[5].mxu1 }
 0x1c4   : > { %v1989_v26 = vpop.f32.mrb[6].mxu0  ;;  %v2038_v27 = vpop.f32.mrb[6].mxu1 }
 0x1c5   : > { %4217 = vpow2.f32 %v3480_v21  ;;  %v3867_v28 = vpop.f32.mrb[7].mxu0  ;;  %v3873_v29 = vpop.f32.mrb[7].mxu1 }
 0x1c6   : > { %4219 = vpow2.f32 %v3481_v24 }
 0x1c7   : > { %v4214_v30 = vpop.eup %4213 }
 0x1c8   : > { %v4216_v31 = vpop.eup %4215  ;;  %v2261_v32 = vadd.f32 1.0, %v4214_v30 }
 0x1c9   : > { %v2262_v33 = vadd.f32 1.0, %v4216_v31 }
 0x1ca   : > { %4221 = vrcp.f32 %v2261_v32  ;;  %v2084_v34 = vpop.f32.mrb[8].mxu0  ;;  %v2133_v36 = vpop.f32.mrb[8].mxu1 }
 0x1cb   : > { %4223 = vrcp.f32 %v2262_v33  ;;  %v3482_v35 = vmul.f32 -1.442695, %v2084_v34  ;;  %v3878_v37 = vpop.f32.mrb[9].mxu0  ;;  %v3483_v38 = vmul.f32 -1.442695, %v2133_v36  ;;  %v3884_v39 = vpop.f32.mrb[9].mxu1 }
 0x1cc   : > { %v2087_v40 = vpop.f32.mrb[10].mxu0  ;;  %v2136_v41 = vpop.f32.mrb[10].mxu1 }
 0x1cd   : > { %4225 = vpow2.f32 %v3482_v35  ;;  %v3879_v44 = vpop.f32.mrb[11].mxu0  ;;  %v3885_v45 = vpop.f32.mrb[11].mxu1 }
 0x1ce   : > { %4227 = vpow2.f32 %v3483_v38 }
 0x1cf   : > { %v4218_v46 = vpop.eup %4217 }
 0x1d0   : > { %v4220_v47 = vpop.eup %4219  ;;  %v2263_v48 = vadd.f32 1.0, %v4218_v46 }
 0x1d1   : > { %v2264_v49 = vadd.f32 1.0, %v4220_v47 }
 0x1d2   : > { %4229 = vrcp.f32 %v2263_v48  ;;  %v2182_v0 = vpop.f32.mrb[12].mxu0  ;;  %v2231_v53 = vpop.f32.mrb[12].mxu1 }
 0x1d3   : > { %4231 = vrcp.f32 %v2264_v49  ;;  %v3484_v52 = vmul.f32 -1.442695, %v2182_v0  ;;  %v3890_v54 = vpop.f32.mrb[13].mxu0  ;;  %v3485_v56 = vmul.f32 -1.442695, %v2231_v53  ;;  %v3896_v59 = vpop.f32.mrb[13].mxu1 }
 0x1d4   : > { %v4222_v55 = vpop.eup %4221  ;;  %v2185_v60 = vpop.f32.mrb[14].mxu0 }
 0x1d5   : > { %v4224_v61 = vpop.eup %4223  ;;  %4233 = vpow2.f32 %v3484_v52  ;;  %v2234_v62 = vpop.f32.mrb[14].mxu1  ;;  %v5100_v1 = vmul.f32 %v4222_v55, %v5083_v42 }
 0x1d6   : > { %v3891_v63 = vpop.f32.mrb[15].mxu0  ;;  %4235 = vpow2.f32 %v3485_v56  ;;  %v3897_v4 = vpop.f32.mrb[15].mxu1  ;;  %v5103_v5 = vmul.f32 %v4224_v61, %v5085_v43 }
 0x1d7   : > { %v4226_v6 = vpop.eup %4225 }
 0x1d8   : > { %v4228_v7 = vpop.eup %4227  ;;  %v2265_v8 = vadd.f32 1.0, %v4226_v6 }
 0x1d9   : > { %v2266_v9 = vadd.f32 1.0, %v4228_v7 }
 0x1da   : > { %4237 = vrcp.f32 %v2265_v8  ;;  %v2325_v10 = vpop.f32.mrb[16].mxu0  ;;  %v2371_v11 = vpop.f32.mrb[16].mxu1 }
 0x1db   : > { %4239 = vrcp.f32 %v2266_v9  ;;  %v3902_v12 = vpop.f32.mrb[17].mxu0  ;;  %v3908_v14 = vpop.f32.mrb[17].mxu1  ;;  %v3503_v36 = vmul.f32 -1.442695, %v2371_v11 }
 0x1dc   : > { %v4230_v13 = vpop.eup %4229  ;;  %v2328_v15 = vpop.f32.mrb[18].mxu0 }
 0x1dd   : > { %v4232_v16 = vpop.eup %4231  ;;  %v2374_v42 = vpop.f32.mrb[18].mxu1  ;;  %v5106_v18 = vmul.f32 %v4230_v13, %v5087_v50 }
 0x1de   : > { %v3903_v17 = vpop.f32.mrb[19].mxu0  ;;  %v3909_v43 = vpop.f32.mrb[19].mxu1  ;;  %v5109_v19 = vmul.f32 %v4232_v16, %v5089_v51  ;;  %v3502_v51 = vmul.f32 -1.442695, %v2325_v10 }
 0x1df   : > { %v4234_v20 = vpop.eup %4233 }
 0x1e0   : > { %v4236_v21 = vpop.eup %4235  ;;  %v2267_v22 = vadd.f32 1.0, %v4234_v20 }
 0x1e1   : > { %v2268_v23 = vadd.f32 1.0, %v4236_v21 }
 0x1e2   : > { %4241 = vrcp.f32 %v2267_v22  ;;  %v2417_v24 = vpop.f32.mrb[20].mxu0  ;;  %v2463_v25 = vpop.f32.mrb[20].mxu1 }
 0x1e3   : > { %4243 = vrcp.f32 %v2268_v23  ;;  %v3914_v26 = vpop.f32.mrb[21].mxu0  ;;  %v3920_v28 = vpop.f32.mrb[21].mxu1  ;;  %v3505_v0 = vmul.f32 -1.442695, %v2463_v25 }
 0x1e4   : > { %v4238_v27 = vpop.eup %4237  ;;  %v2420_v29 = vpop.f32.mrb[22].mxu0  ;;  %4245 = vpow2.f32 %v3502_v51  ;;  %v4293_v51 = vld [vmem:[%s4682_s13] sm:$0x3] }
 0x1e5   : > { %v4240_v30 = vpop.eup %4239  ;;  %v2466_v31 = vpop.f32.mrb[22].mxu1  ;;  %v5112_v32 = vmul.f32 %v4238_v27, %v5091_v57  ;;  %v3504_v57 = vmul.f32 -1.442695, %v2417_v24  ;;  %4247 = vpow2.f32 %v3503_v36  ;;  %v4294_v36 = vld [vmem:[%s4682_s13 + $0x2] sm:$0x3] }
 0x1e6   : > { %v3915_v50 = vpop.f32.mrb[23].mxu0  ;;  %v3921_v33 = vpop.f32.mrb[23].mxu1  ;;  %v5115_v34 = vmul.f32 %v4240_v30, %v5093_v58 }
 0x1e7   : > { %4249 = vpow2.f32 %v3504_v57 }
 0x1e8   : > { %4251 = vpow2.f32 %v3505_v0 }
 0x1ea   : > { %v2509_v35 = vpop.f32.mrb[24].mxu0  ;;  %v2555_v37 = vpop.f32.mrb[24].mxu1 }
 0x1eb   : > { %v3926_v38 = vpop.f32.mrb[25].mxu0  ;;  %v3932_v40 = vpop.f32.mrb[25].mxu1 }
 0x1ec   : > { %v4242_v39 = vpop.eup %4241  ;;  %v2512_v41 = vpop.f32.mrb[26].mxu0 }
 0x1ed   : > { %v4244_v44 = vpop.eup %4243  ;;  %v2558_v45 = vpop.f32.mrb[26].mxu1  ;;  %v5118_v47 = vmul.f32 %v4242_v39, %v5095_v2  ;;  %v3506_v2 = vmul.f32 -1.442695, %v2509_v35 }
 0x1ee   : > { %v3927_v46 = vpop.f32.mrb[27].mxu0  ;;  %v3933_v48 = vpop.f32.mrb[27].mxu1  ;;  %v5121_v49 = vmul.f32 %v4244_v44, %v5097_v3  ;;  %v3507_v3 = vmul.f32 -1.442695, %v2555_v37 }
 0x1ef   : > { %v4246_v54 = vpop.eup %4245 }
 0x1f0   : > { %v2677_v62 = vadd.f32 1.0, %v4246_v54  ;;  %v4248_v63 = vpop.eup %4247 }
 0x1f1   : > { %v4250_v9 = vpop.eup %4249  ;;  %v2678_v10 = vadd.f32 1.0, %v4248_v63  ;;  %v4296_v63 = vld [vmem:[%s4682_s13 + $0x6] sm:$0x3] }
 0x1f2   : > { %v2601_v58 = vpop.f32.mrb[28].mxu0  ;;  %v2647_v52 = vpop.f32.mrb[28].mxu1  ;;  %4253 = vrcp.f32 %v2677_v62  ;;  %v2679_v42 = vadd.f32 1.0, %v4250_v9 }
 0x1f3   : > { %v3938_v53 = vpop.f32.mrb[29].mxu0  ;;  %v3944_v55 = vpop.f32.mrb[29].mxu1  ;;  %4255 = vpow2.f32 %v3506_v2  ;;  %v3508_v17 = vmul.f32 -1.442695, %v2601_v58  ;;  %v3509_v20 = vmul.f32 -1.442695, %v2647_v52 }
 0x1f4   : > { %v2604_v56 = vpop.f32.mrb[30].mxu0  ;;  %v2650_v59 = vpop.f32.mrb[30].mxu1 }
 0x1f5   : > { %v3939_v60 = vpop.f32.mrb[31].mxu0  ;;  %v3945_v61 = vpop.f32.mrb[31].mxu1 }
 0x1f6   : > { %v4252_v43 = vpop.eup %4251  ;;  %v4295_v61 = vld [vmem:[%s4682_s13 + $0x4] sm:$0x3] }
 0x1fa   : > { %v2749_v4 = vpop.f32.mrb[48].mxu0  ;;  %v2795_v7 = vpop.f32.mrb[48].mxu1 }
 0x1fb   : > { %v2750_v6 = vadd.f32 %v2749_v4, %v5100_v1  ;;  %v3950_v8 = vpop.f32.mrb[49].mxu0  ;;  %v2796_v11 = vadd.f32 %v2795_v7, %v5103_v5  ;;  %v3956_v12 = vpop.f32.mrb[49].mxu1  ;;  %v2680_v5 = vadd.f32 1.0, %v4252_v43 }
 0x1fc   : > { %v2752_v13 = vpop.f32.mrb[50].mxu0  ;;  %v2798_v14 = vpop.f32.mrb[50].mxu1 }
 0x1fd   : > { %4257 = vtanh.f32 %v2750_v6  ;;  %v3951_v15 = vpop.f32.mrb[51].mxu0  ;;  %v3957_v16 = vpop.f32.mrb[51].mxu1 }
 0x1fe   : > { %4259 = vtanh.f32 %v2796_v11  ;;  %v4254_v27 = vpop.eup %4253 }
 0x1ff   : > { %4261 = vpow2.f32 %v3507_v3  ;;  %v4256_v30 = vpop.eup %4255 }
 0x200   : > { %4263 = vrcp.f32 %v2678_v10  ;;  %v2681_v40 = vadd.f32 1.0, %v4256_v30 }
 0x201   : > { %4265 = vrcp.f32 %v2679_v42 }
 0x202   : > { %v2841_v1 = vpop.f32.mrb[52].mxu0  ;;  %v2887_v22 = vpop.f32.mrb[52].mxu1  ;;  %4267 = vpow2.f32 %v3508_v17 }
 0x203   : > { %v2842_v21 = vadd.f32 %v2841_v1, %v5106_v18  ;;  %v3962_v23 = vpop.f32.mrb[53].mxu0  ;;  %v2888_v24 = vadd.f32 %v2887_v22, %v5109_v19  ;;  %v3968_v25 = vpop.f32.mrb[53].mxu1 }
 0x204   : > { %v2844_v26 = vpop.f32.mrb[54].mxu0  ;;  %v2890_v28 = vpop.f32.mrb[54].mxu1 }
 0x205   : > { %4269 = vtanh.f32 %v2842_v21  ;;  %v3963_v29 = vpop.f32.mrb[55].mxu0  ;;  %v3969_v31 = vpop.f32.mrb[55].mxu1 }
 0x206   : > { %4271 = vtanh.f32 %v2888_v24 }
 0x207   : > { %v4258_v50 = vpop.eup %4257  ;;  %4273 = vpow2.f32 %v3509_v20 }
 0x208   : > { %v4260_v18 = vpop.eup %4259  ;;  %4275 = vrcp.f32 %v2680_v5  ;;  %v3085_v33 = vsub.f32 %v4293_v51, %v4258_v50  ;;  %v4298_v5 = vld [vmem:[%s4682_s13 + $0xa] sm:$0x3] }
 0x209   : > { %v4262_v35 = vpop.eup %4261  ;;  %v3086_v37 = vsub.f32 %v4294_v36, %v4260_v18 }
 0x20a   : > { %v4264_v19 = vpop.eup %4263  ;;  %v3093_v38 = vmul.f32 %v4254_v27, %v3085_v33  ;;  %v2933_v39 = vpop.f32.mrb[56].mxu0  ;;  %v2682_v57 = vadd.f32 1.0, %v4262_v35  ;;  %v4300_v33 = vld [vmem:[%s4682_s13 + $0xe] sm:$0x3] }
 0x20b   : > { %v3094_v41 = vmul.f32 %v4264_v19, %v3086_v37  ;;  %v2934_v44 = vadd.f32 %v2933_v39, %v5112_v32  ;;  %v2979_v45 = vpop.f32.mrb[56].mxu1  ;;  %v3974_v46 = vpop.f32.mrb[57].mxu0 }
 0x20c   : > { %v3101_v48 = vadd.f32 %v4258_v50, %v3093_v38  ;;  %v2980_v58 = vadd.f32 %v2979_v45, %v5115_v34  ;;  %v3980_v0 = vpop.f32.mrb[57].mxu1  ;;  %v2936_v52 = vpop.f32.mrb[58].mxu0  ;;  %v4299_v50 = vld [vmem:[%s4682_s13 + $0xc] sm:$0x3] }
 0x20d   : > { %v4266_v53 = vpop.eup %4265  ;;  %v3102_v54 = vadd.f32 %v4260_v18, %v3094_v41  ;;  %4277 = vtanh.f32 %v2934_v44  ;;  %v2982_v55 = vpop.f32.mrb[58].mxu1 }
 0x20e   : > { %v3975_v56 = vpop.f32.mrb[59].mxu0  ;;  %v4268_v59 = vpop.eup %4267  ;;  %3110 = vst.msk [vmem:[%s5132_s26] sm:$0x3] %vm3109_vm3, %v3101_v48  ;;  %4279 = vtanh.f32 %v2980_v58 }
 0x20f   : > { %v3981_v32 = vpop.f32.mrb[59].mxu1  ;;  %v4270_v60 = vpop.eup %4269  ;;  %4281 = vrcp.f32 %v2681_v40  ;;  %3111 = vst.msk [vmem:[%s5132_s26 + $0x2] sm:$0x3] %vm3109_vm3, %v3102_v54  ;;  %v2683_v8 = vadd.f32 1.0, %v4268_v59 }
 0x210   : > { %v4272_v34 = vpop.eup %4271  ;;  %4283 = vrcp.f32 %v2682_v57  ;;  %v3087_v62 = vsub.f32 %v4295_v61, %v4270_v60 }
 0x211   : > { %v4274_v2 = vpop.eup %4273  ;;  %v3088_v4 = vsub.f32 %v4296_v63, %v4272_v34 }
 0x212   : > { %v4276_v3 = vpop.eup %4275  ;;  %v3095_v6 = vmul.f32 %v4266_v53, %v3087_v62  ;;  %v3025_v7 = vpop.f32.mrb[60].mxu0  ;;  %v2684_v13 = vadd.f32 1.0, %v4274_v2 }
 0x213   : > { %v3096_v9 = vmul.f32 %v4276_v3, %v3088_v4  ;;  %v3026_v10 = vadd.f32 %v3025_v7, %v5118_v47  ;;  %v3071_v11 = vpop.f32.mrb[60].mxu1  ;;  %v3986_v12 = vpop.f32.mrb[61].mxu0 }
 0x214   : > { %v3103_v14 = vadd.f32 %v4270_v60, %v3095_v6  ;;  %v3072_v15 = vadd.f32 %v3071_v11, %v5121_v49  ;;  %v3992_v16 = vpop.f32.mrb[61].mxu1  ;;  %v3028_v42 = vpop.f32.mrb[62].mxu0  ;;  %v4297_v49 = vld [vmem:[%s4682_s13 + $0x8] sm:$0x3] }
 0x215   : > { %v3104_v17 = vadd.f32 %v4272_v34, %v3096_v9  ;;  %4285 = vtanh.f32 %v3026_v10  ;;  %v3074_v43 = vpop.f32.mrb[62].mxu1  ;;  %v3987_v1 = vpop.f32.mrb[63].mxu0 }
 0x216   : > { %3112 = vst.msk [vmem:[%s5132_s26 + $0x4] sm:$0x3] %vm3109_vm3, %v3103_v14  ;;  %4287 = vtanh.f32 %v3072_v15  ;;  %v3993_v20 = vpop.f32.mrb[63].mxu1 }
 0x217   : > { %v4278_v47 = vpop.eup %4277  ;;  %4289 = vrcp.f32 %v2683_v8  ;;  %3113 = vst.msk [vmem:[%s5132_s26 + $0x6] sm:$0x3] %vm3109_vm3, %v3104_v17 }
 0x218   : > { %v4280_v21 = vpop.eup %4279  ;;  %4291 = vrcp.f32 %v2684_v13  ;;  %v3089_v22 = vsub.f32 %v4297_v49, %v4278_v47 }
 0x219   : > { %v4282_v23 = vpop.eup %4281  ;;  %v3090_v24 = vsub.f32 %v4298_v5, %v4280_v21 }
 0x21a   : > { %v4284_v25 = vpop.eup %4283  ;;  %v3097_v26 = vmul.f32 %v4282_v23, %v3089_v22 }
 0x21b   : > { %v3098_v27 = vmul.f32 %v4284_v25, %v3090_v24 }
 0x21c   : > { %v3105_v28 = vadd.f32 %v4278_v47, %v3097_v26 }
 0x21d   : > { %v3106_v29 = vadd.f32 %v4280_v21, %v3098_v27 }
 0x21e   : > { %3114 = vst.msk [vmem:[%s5132_s26 + $0x8] sm:$0x3] %vm3109_vm3, %v3105_v28 }
 0x21f   : > { %v4286_v30 = vpop.eup %4285  ;;  %3115 = vst.msk [vmem:[%s5132_s26 + $0xa] sm:$0x3] %vm3109_vm3, %v3106_v29 }
 0x220   : > { %v4288_v31 = vpop.eup %4287  ;;  %v3091_v18 = vsub.f32 %v4299_v50, %v4286_v30 }
 0x221   : > { %v4290_v51 = vpop.eup %4289  ;;  %v3092_v35 = vsub.f32 %v4300_v33, %v4288_v31 }
 0x222   : > { %v4292_v36 = vpop.eup %4291  ;;  %v3099_v37 = vmul.f32 %v4290_v51, %v3091_v18 }
 0x223   : > { %v3100_v19 = vmul.f32 %v4292_v36, %v3092_v35 }
 0x224   : > { %v3107_v38 = vadd.f32 %v4286_v30, %v3099_v37 }
 0x225   : > { %v3108_v39 = vadd.f32 %v4288_v31, %v3100_v19 }
 0x226   : > { %3116 = vst.msk [vmem:[%s5132_s26 + $0xc] sm:$0x3] %vm3109_vm3, %v3107_v38 }
 0x227   : > { %3117 = vst.msk [vmem:[%s5132_s26 + $0xe] sm:$0x3] %vm3109_vm3, %v3108_v39 }
 0x228   : > { %4370 = shalt.err (!%p4367_p9)
}
 0x229   : > { %s4371_s14 = scalar_lea.hbm %s5159_s22, 256  ;;  %s4375_s9 = scalar_lea.hbm %s5213_s4, 512 }
 0x22a   : > { %p4372_p10 = scmp.ne.s32.totalorder %s5159_s22, %s4371_s14  ;;  %p4376_p11 = scmp.lt.u32.totalorder %s5159_s22, %s5213_s4 }
 0x22b   : > { %p4377_p4 = scmp.lt.u32.totalorder %s4375_s9, %s4371_s14  ;;  %p4379_p5 = scmp.lt.u32.totalorder %s4371_s14, %s5159_s22 }
 0x22c   : > { %p4373_p0 = pnand %p4372_p10, %p5222_p6 }
 0x22d   : > { %p4378_p7 = por %p4377_p4, %p4376_p11 }
 0x22e   : > { %p4374_p3 = pneg %p4373_p0 }
 0x22f   : > { %p4380_p8 = por %p4379_p5, %p4378_p7 }
 0x231   : > { %p4381_p12 = pnand %p4380_p8, %p4374_p3 }
 0x233   : > { %4384 = shalt.err (!%p4381_p12)
}
 0x234   : > { %s4452_s8 = smov 32   ;;  %s4453_s26 = smov 2  }
 0x235   : > { %4084 = dma.vmem_to_hbm [thread:$0]  (%p5222_p6), %s5161_s30, 256, %s5159_s22, %s3119_s19, %s4452_s8, %s4452_s8, %s4453_s26  }
 0x236 PF: > { %s3147_s10 = sand.u32 1, %s4419_s15   ;;  %p5223_p13 = scmp.ne.s32.totalorder %s5220_s28, 0 }
 0x237   : > { %p5224_p1 = scmp.ge.s32.totalorder %s4431_s18, 2  ;;  %s3148_s11 = scalar_lea.sflag [#allocation4], %s3147_s10 }
 0x239   : > { %p4087_p2 = pnand %p5224_p1, %p5223_p13 }
 0x23b   : > { %4414 = dma.done.wait (!%p4087_p2), %s3148_s11, 256  }
 0x23c   : > { %4416 = vsyncadd (!%p4087_p2), %s3148_s11, 4294967040  ;;  %p23_p9 = scmp.ge.s32.totalorder %s4504_s21, 4   ;;  %s5225_s15 = smov %s4423_s16 }
 0x23d   : > { %s5226_s16 = smov %s4427_s17  ;;  %s5227_s17 = smov %s4516_s24 }
 0x23e   : > { %s5228_s18 = smov %s4504_s21  ;;  %25 = sbr.rel (!%p23_p9) target bundleno = 11 (0xb), region = 132 }
 0x245   :  { %3153 = vsyncpa [#allocation3], 1 }
 0x246   :  { %3155 = vsyncpa [#allocation3 + $0x1], 1 }
 0x247   :  { %3156 = vsyncpa [#allocation6], 1 }
 0x248   :  { %3158 = vsyncpa [#allocation6 + $0x1], 1 }
 0x249   :  { %3159 = vsyncpa [#allocation9], 1 }
 0x24a   :  { %3161 = vsyncpa [#allocation9 + $0x1], 1 }
 0x24b   :  { %3162 = vsyncpa [#allocation4], 1 }
 0x24c   :  { %3164 = vsyncpa [#allocation4 + $0x1], 1 }

</bundles_post_ra>
